<compile_context>
chip_gen: v6e
topology: v6e:2x2x1
jax: 0.10.0
libtpu: 0.0.40
codegen_flags: <defaults>
</compile_context>

<pallas_src>
import functools

import jax
import jax.numpy as jnp
from jax.experimental import pallas as pl
from jax.experimental.pallas import tpu as pltpu

# Layer widths of the PyTorch nn.Sequential.
DIMS = [64, 128, 256, 512, 512, 512, 256, 128, 3]
NUM_LAYERS = len(DIMS) - 1  # 8
OUT_PAD = 128               # last layer's 3 outputs padded to a full 128-lane block
PADDED_DIMS = DIMS[:-1] + [OUT_PAD]


def _round_up(x, m):
    return (x + m - 1) // m * m


def _detect_tpu():
    kind = ""
    try:
        kind = jax.devices()[0].device_kind.lower()
    except Exception:
        pass
    is_v5 = "v5" in kind
    is_v7 = "v7" in kind or "tpu7" in kind
    return is_v5, is_v7


_IS_V5, _IS_V7 = _detect_tpu()
# v6e / v7x have bf16 VALUs -> bf16 bias+ReLU epilogue; v5e keeps f32 epilogue.
_BF16_EPILOGUE = not _IS_V5
# v7x has 64 MiB physical VMEM -> stay well below; v5e/v6e have 128 MiB.
_VMEM_LIMIT = (40 if _IS_V7 else 64) * 1024 * 1024


def _make_kernel(bf16_epilogue):
    def _mlp_kernel(x_ref, *refs):
        # refs = (w1, b1, w2, b2, ..., w8, b8, o_ref)
        o_ref = refs[-1]
        param_refs = refs[:-1]

        h = x_ref[...]  # (TM, 64) f32
        for layer in range(NUM_LAYERS):
            w_ref = param_refs[2 * layer]      # (in, out); f32 for layer 0, bf16 after
            b_ref = param_refs[2 * layer + 1]  # (1, out)
            # MXU matmul with f32 accumulation (bf16 x bf16 except layer 0).
            acc = jnp.dot(h.astype(w_ref.dtype), w_ref[...],
                          preferred_element_type=jnp.float32)
            if layer < NUM_LAYERS - 1:
                if bf16_epilogue:
                    # bf16 bias add + ReLU (v6e/v7x VALU): halves VPU slots and
                    # materializes the inter-layer activation directly in bf16.
                    h = jnp.maximum(acc.astype(jnp.bfloat16) + b_ref[...], 0)
                else:
                    # v5e: f32 epilogue, then store the activation in bf16.
                    h = jnp.maximum(acc + b_ref[...], 0.0).astype(jnp.bfloat16)
            else:
                # Final layer: f32 bias add + Sigmoid (EUP), f32 output.
                h = jax.nn.sigmoid(acc + b_ref[...])
        o_ref[...] = h.astype(o_ref.dtype)

    return _mlp_kernel


@functools.partial(jax.jit, static_argnames=("tile_m",))
def fourier_mlp_pallas(x, params, tile_m=None):
    """x: (B, 64) f32; params: flat list [w1, b1, ..., w8, b8] with
    wi (in, out) (i.e. PyTorch W.T) and bi (1, out), all float32."""
    B = x.shape[0]

    # ---- batch tiling ------------------------------------------------------
    if tile_m is None:
        tile_m = 2048 if B >= 4096 else 1024
    tile_m = max(256, _round_up(tile_m, 256))

    B_eff = _round_up(B, 16)  # keep the bf16 LHS tile at >= native (16,128) tiling
    if B_eff <= 256:
        tm = B_eff            # tiny batch: one small tile, minimal padding
    else:
        n_steps = pl.cdiv(B_eff, tile_m)
        if B_eff >= 512:
            # Guarantee >= 2 grid steps so both v7x TensorCores get work
            # (no-op overhead on single-TC v5e/v6e).
            n_steps = max(n_steps, 2)
        tm = min(tile_m, _round_up(pl.cdiv(B_eff, n_steps), 256))

    B_pad = _round_up(B, tm)
    if B_pad != B:
        x = jnp.pad(x, ((0, B_pad - B), (0, 0)))
    grid_steps = B_pad // tm

    # ---- parameter prep ----------------------------------------------------
    # Layer 0 weights stay f32 (<1% of FLOPs, protects accuracy); the rest bf16.
    # Hidden biases match the epilogue dtype; final bias stays f32.
    prepped = []
    for layer in range(NUM_LAYERS):
        w = params[2 * layer]
        b = params[2 * layer + 1]
        last = layer == NUM_LAYERS - 1
        if last:
            w = jnp.pad(w, ((0, 0), (0, OUT_PAD - w.shape[1])))
            b = jnp.pad(b, ((0, 0), (0, OUT_PAD - b.shape[1])))
        w_dtype = jnp.float32 if layer == 0 else jnp.bfloat16
        b_dtype = jnp.float32 if (last or not _BF16_EPILOGUE) else jnp.bfloat16
        prepped.append(w.astype(w_dtype))
        prepped.append(b.astype(b_dtype))

    # ---- specs -------------------------------------------------------------
    in_specs = [pl.BlockSpec((tm, DIMS[0]), lambda i: (i, 0))]
    for layer in range(NUM_LAYERS):
        din, dout = PADDED_DIMS[layer], PADDED_DIMS[layer + 1]
        # Weights / biases: full-array blocks, same block for every grid step.
        in_specs.append(pl.BlockSpec((din, dout), lambda i: (0, 0)))
        in_specs.append(pl.BlockSpec((1, dout), lambda i: (0, 0)))
    out_spec = pl.BlockSpec((tm, OUT_PAD), lambda i: (i, 0))

    # ---- cost estimate (advisory) ------------------------------------------
    flops = 2 * B_pad * sum(PADDED_DIMS[l] * PADDED_DIMS[l + 1]
                            for l in range(NUM_LAYERS))
    weight_bytes = sum(PADDED_DIMS[l] * PADDED_DIMS[l + 1] * 2
                       for l in range(NUM_LAYERS))
    cost = pl.CostEstimate(
        flops=flops,
        transcendentals=B_pad * OUT_PAD,                       # final sigmoid
        bytes_accessed=B_pad * (DIMS[0] * 4 + OUT_PAD * 4) + weight_bytes,
    )

    out = pl.pallas_call(
        _make_kernel(_BF16_EPILOGUE),
        out_shape=jax.ShapeDtypeStruct((B_pad, OUT_PAD), jnp.float32),
        grid_spec=pltpu.PrefetchScalarGridSpec(
            num_scalar_prefetch=0,
            grid=(grid_steps,),
            in_specs=in_specs,
            out_specs=out_spec,
        ),
        compiler_params=pltpu.CompilerParams(
            dimension_semantics=("parallel",),
            vmem_limit_bytes=_VMEM_LIMIT,
        ),
        cost_estimate=cost,
    )(x, *prepped)

    # Drop batch padding and the 125 zero-padded output lanes.
    return out[:B, :DIMS[-1]]


def init_params(key):
    """Deterministic init mimicking PyTorch nn.Linear defaults (U(-1/sqrt(in), 1/sqrt(in)))."""
    params = []
    for layer in range(NUM_LAYERS):
        din, dout = DIMS[layer], DIMS[layer + 1]
        key, kw, kb = jax.random.split(key, 3)
        bound = 1.0 / jnp.sqrt(jnp.float32(din))
        # Stored as (in, out) == W.T relative to PyTorch's (out, in).
        w = jax.random.uniform(kw, (din, dout), jnp.float32, -bound, bound)
        b = jax.random.uniform(kb, (1, dout), jnp.float32, -bound, bound)
        params += [w, b]
    return params


def reference_mlp(x, params):
    h = x
    for layer in range(NUM_LAYERS):
        w, b = params[2 * layer], params[2 * layer + 1]
        h = h @ w + b
        h = jnp.maximum(h, 0.0) if layer < NUM_LAYERS - 1 else jax.nn.sigmoid(h)
    return h


if __name__ == "__main__":
    key = jax.random.PRNGKey(0)
    key, kx1, kx2 = jax.random.split(key, 3)
    params = init_params(key)

    # Case 1: small batch (single grid step, tile shrinks to 16 rows).
    B1 = 8
    x1 = jax.random.normal(kx1, (B1, DIMS[0]), jnp.float32)
    out1 = jax.block_until_ready(fourier_mlp_pallas(x1, params))
    ref1 = reference_mlp(x1, params)
    assert out1.shape == (B1, 3)
    assert jnp.allclose(out1, ref1, atol=5e-2, rtol=5e-2), "mismatch vs JAX reference (B=8)"

    # Case 2: non-multiple batch, large enough to force a >=2-step "parallel"
    # grid (exercises padding, pipelining and the v7x dual-core path).
    B2 = 1100
    x2 = jax.random.normal(kx2, (B2, DIMS[0]), jnp.float32)
    out2 = jax.block_until_ready(fourier_mlp_pallas(x2, params))
    ref2 = reference_mlp(x2, params)
    assert out2.shape == (B2, 3)
    assert jnp.allclose(out2, ref2, atol=5e-2, rtol=5e-2), "mismatch vs JAX reference (B=1100)"

    print("KERNEL_OK")
</pallas_src>

<mosaic_0001>
module attributes {stable_mosaic.version = 11 : i64} {
  func.func @_mlp_kernel(%arg0: i32, %arg1: memref<16x64xf32, #tpu.memory_space<vmem>>, %arg2: memref<64x128xf32, #tpu.memory_space<vmem>>, %arg3: memref<1x128xbf16, #tpu.memory_space<vmem>>, %arg4: memref<128x256xbf16, #tpu.memory_space<vmem>>, %arg5: memref<1x256xbf16, #tpu.memory_space<vmem>>, %arg6: memref<256x512xbf16, #tpu.memory_space<vmem>>, %arg7: memref<1x512xbf16, #tpu.memory_space<vmem>>, %arg8: memref<512x512xbf16, #tpu.memory_space<vmem>>, %arg9: memref<1x512xbf16, #tpu.memory_space<vmem>>, %arg10: memref<512x512xbf16, #tpu.memory_space<vmem>>, %arg11: memref<1x512xbf16, #tpu.memory_space<vmem>>, %arg12: memref<512x256xbf16, #tpu.memory_space<vmem>>, %arg13: memref<1x256xbf16, #tpu.memory_space<vmem>>, %arg14: memref<256x128xbf16, #tpu.memory_space<vmem>>, %arg15: memref<1x128xbf16, #tpu.memory_space<vmem>>, %arg16: memref<128x128xbf16, #tpu.memory_space<vmem>>, %arg17: memref<1x128xf32, #tpu.memory_space<vmem>>, %arg18: memref<16x128xf32, #tpu.memory_space<vmem>>) attributes {dimension_semantics = [#tpu.dimension_semantics<parallel>], iteration_bounds = array<i64: 1>, scalar_prefetch = 0 : i64, scratch_operands = 0 : i64, tpu.core_type = #tpu.core_type<tc>, window_params = [{transform_indices = @transform_0, window_bounds = array<i64: 16, 64>}, {pipeline_mode = #tpu.pipeline_mode<synchronous>, transform_indices = @transform_1, window_bounds = array<i64: 64, 128>}, {pipeline_mode = #tpu.pipeline_mode<synchronous>, transform_indices = @transform_2, window_bounds = array<i64: 1, 128>}, {pipeline_mode = #tpu.pipeline_mode<synchronous>, transform_indices = @transform_3, window_bounds = array<i64: 128, 256>}, {pipeline_mode = #tpu.pipeline_mode<synchronous>, transform_indices = @transform_4, window_bounds = array<i64: 1, 256>}, {pipeline_mode = #tpu.pipeline_mode<synchronous>, transform_indices = @transform_5, window_bounds = array<i64: 256, 512>}, {pipeline_mode = #tpu.pipeline_mode<synchronous>, transform_indices = @transform_6, window_bounds = array<i64: 1, 512>}, {pipeline_mode = #tpu.pipeline_mode<synchronous>, transform_indices = @transform_7, window_bounds = array<i64: 512, 512>}, {pipeline_mode = #tpu.pipeline_mode<synchronous>, transform_indices = @transform_8, window_bounds = array<i64: 1, 512>}, {pipeline_mode = #tpu.pipeline_mode<synchronous>, transform_indices = @transform_9, window_bounds = array<i64: 512, 512>}, {pipeline_mode = #tpu.pipeline_mode<synchronous>, transform_indices = @transform_10, window_bounds = array<i64: 1, 512>}, {pipeline_mode = #tpu.pipeline_mode<synchronous>, transform_indices = @transform_11, window_bounds = array<i64: 512, 256>}, {pipeline_mode = #tpu.pipeline_mode<synchronous>, transform_indices = @transform_12, window_bounds = array<i64: 1, 256>}, {pipeline_mode = #tpu.pipeline_mode<synchronous>, transform_indices = @transform_13, window_bounds = array<i64: 256, 128>}, {pipeline_mode = #tpu.pipeline_mode<synchronous>, transform_indices = @transform_14, window_bounds = array<i64: 1, 128>}, {pipeline_mode = #tpu.pipeline_mode<synchronous>, transform_indices = @transform_15, window_bounds = array<i64: 128, 128>}, {pipeline_mode = #tpu.pipeline_mode<synchronous>, transform_indices = @transform_16, window_bounds = array<i64: 1, 128>}, {transform_indices = @transform_17, window_bounds = array<i64: 16, 128>}]} {
    %c0 = arith.constant 0 : index
    %c0_0 = arith.constant 0 : index
    %0 = vector.load %arg1[%c0, %c0_0] : memref<16x64xf32, #tpu.memory_space<vmem>>, vector<16x64xf32>
    %c0_1 = arith.constant 0 : index
    %c0_2 = arith.constant 0 : index
    %1 = vector.load %arg2[%c0_1, %c0_2] : memref<64x128xf32, #tpu.memory_space<vmem>>, vector<64x128xf32>
    %cst = arith.constant dense<0.000000e+00> : vector<16x128xf32>
    %2 = tpu.matmul %0, %1, %cst {dimension_numbers = #tpu.dot_dimension_numbers<[1], [0], [0], [1], [0, 0, 1, 1], [], []>} : vector<16x64xf32>, vector<64x128xf32>, vector<16x128xf32> -> vector<16x128xf32>
    %3 = arith.truncf %2 : vector<16x128xf32> to vector<16x128xbf16>
    %c0_3 = arith.constant 0 : index
    %c0_4 = arith.constant 0 : index
    %4 = vector.load %arg3[%c0_3, %c0_4] : memref<1x128xbf16, #tpu.memory_space<vmem>>, vector<1x128xbf16>
    %5 = vector.broadcast %4 : vector<1x128xbf16> to vector<16x128xbf16>
    %6 = arith.addf %3, %5 : vector<16x128xbf16>
    %cst_5 = arith.constant 0.000000e+00 : bf16
    %7 = vector.broadcast %cst_5 : bf16 to vector<16x128xbf16>
    %8 = arith.maximumf %6, %7 : vector<16x128xbf16>
    %c0_6 = arith.constant 0 : index
    %c0_7 = arith.constant 0 : index
    %9 = vector.load %arg4[%c0_6, %c0_7] : memref<128x256xbf16, #tpu.memory_space<vmem>>, vector<128x256xbf16>
    %cst_8 = arith.constant dense<0.000000e+00> : vector<16x256xf32>
    %10 = tpu.matmul %8, %9, %cst_8 {dimension_numbers = #tpu.dot_dimension_numbers<[1], [0], [0], [1], [0, 0, 1, 1], [], []>} : vector<16x128xbf16>, vector<128x256xbf16>, vector<16x256xf32> -> vector<16x256xf32>
    %11 = arith.truncf %10 : vector<16x256xf32> to vector<16x256xbf16>
    %c0_9 = arith.constant 0 : index
    %c0_10 = arith.constant 0 : index
    %12 = vector.load %arg5[%c0_9, %c0_10] : memref<1x256xbf16, #tpu.memory_space<vmem>>, vector<1x256xbf16>
    %13 = vector.broadcast %12 : vector<1x256xbf16> to vector<16x256xbf16>
    %14 = arith.addf %11, %13 : vector<16x256xbf16>
    %cst_11 = arith.constant 0.000000e+00 : bf16
    %15 = vector.broadcast %cst_11 : bf16 to vector<16x256xbf16>
    %16 = arith.maximumf %14, %15 : vector<16x256xbf16>
    %c0_12 = arith.constant 0 : index
    %c0_13 = arith.constant 0 : index
    %17 = vector.load %arg6[%c0_12, %c0_13] : memref<256x512xbf16, #tpu.memory_space<vmem>>, vector<256x512xbf16>
    %cst_14 = arith.constant dense<0.000000e+00> : vector<16x512xf32>
    %18 = tpu.matmul %16, %17, %cst_14 {dimension_numbers = #tpu.dot_dimension_numbers<[1], [0], [0], [1], [0, 0, 1, 1], [], []>} : vector<16x256xbf16>, vector<256x512xbf16>, vector<16x512xf32> -> vector<16x512xf32>
    %19 = arith.truncf %18 : vector<16x512xf32> to vector<16x512xbf16>
    %c0_15 = arith.constant 0 : index
    %c0_16 = arith.constant 0 : index
    %20 = vector.load %arg7[%c0_15, %c0_16] : memref<1x512xbf16, #tpu.memory_space<vmem>>, vector<1x512xbf16>
    %21 = vector.broadcast %20 : vector<1x512xbf16> to vector<16x512xbf16>
    %22 = arith.addf %19, %21 : vector<16x512xbf16>
    %cst_17 = arith.constant 0.000000e+00 : bf16
    %23 = vector.broadcast %cst_17 : bf16 to vector<16x512xbf16>
    %24 = arith.maximumf %22, %23 : vector<16x512xbf16>
    %c0_18 = arith.constant 0 : index
    %c0_19 = arith.constant 0 : index
    %25 = vector.load %arg8[%c0_18, %c0_19] : memref<512x512xbf16, #tpu.memory_space<vmem>>, vector<512x512xbf16>
    %cst_20 = arith.constant dense<0.000000e+00> : vector<16x512xf32>
    %26 = tpu.matmul %24, %25, %cst_20 {dimension_numbers = #tpu.dot_dimension_numbers<[1], [0], [0], [1], [0, 0, 1, 1], [], []>} : vector<16x512xbf16>, vector<512x512xbf16>, vector<16x512xf32> -> vector<16x512xf32>
    %27 = arith.truncf %26 : vector<16x512xf32> to vector<16x512xbf16>
    %c0_21 = arith.constant 0 : index
    %c0_22 = arith.constant 0 : index
    %28 = vector.load %arg9[%c0_21, %c0_22] : memref<1x512xbf16, #tpu.memory_space<vmem>>, vector<1x512xbf16>
    %29 = vector.broadcast %28 : vector<1x512xbf16> to vector<16x512xbf16>
    %30 = arith.addf %27, %29 : vector<16x512xbf16>
    %cst_23 = arith.constant 0.000000e+00 : bf16
    %31 = vector.broadcast %cst_23 : bf16 to vector<16x512xbf16>
    %32 = arith.maximumf %30, %31 : vector<16x512xbf16>
    %c0_24 = arith.constant 0 : index
    %c0_25 = arith.constant 0 : index
    %33 = vector.load %arg10[%c0_24, %c0_25] : memref<512x512xbf16, #tpu.memory_space<vmem>>, vector<512x512xbf16>
    %cst_26 = arith.constant dense<0.000000e+00> : vector<16x512xf32>
    %34 = tpu.matmul %32, %33, %cst_26 {dimension_numbers = #tpu.dot_dimension_numbers<[1], [0], [0], [1], [0, 0, 1, 1], [], []>} : vector<16x512xbf16>, vector<512x512xbf16>, vector<16x512xf32> -> vector<16x512xf32>
    %35 = arith.truncf %34 : vector<16x512xf32> to vector<16x512xbf16>
    %c0_27 = arith.constant 0 : index
    %c0_28 = arith.constant 0 : index
    %36 = vector.load %arg11[%c0_27, %c0_28] : memref<1x512xbf16, #tpu.memory_space<vmem>>, vector<1x512xbf16>
    %37 = vector.broadcast %36 : vector<1x512xbf16> to vector<16x512xbf16>
    %38 = arith.addf %35, %37 : vector<16x512xbf16>
    %cst_29 = arith.constant 0.000000e+00 : bf16
    %39 = vector.broadcast %cst_29 : bf16 to vector<16x512xbf16>
    %40 = arith.maximumf %38, %39 : vector<16x512xbf16>
    %c0_30 = arith.constant 0 : index
    %c0_31 = arith.constant 0 : index
    %41 = vector.load %arg12[%c0_30, %c0_31] : memref<512x256xbf16, #tpu.memory_space<vmem>>, vector<512x256xbf16>
    %cst_32 = arith.constant dense<0.000000e+00> : vector<16x256xf32>
    %42 = tpu.matmul %40, %41, %cst_32 {dimension_numbers = #tpu.dot_dimension_numbers<[1], [0], [0], [1], [0, 0, 1, 1], [], []>} : vector<16x512xbf16>, vector<512x256xbf16>, vector<16x256xf32> -> vector<16x256xf32>
    %43 = arith.truncf %42 : vector<16x256xf32> to vector<16x256xbf16>
    %c0_33 = arith.constant 0 : index
    %c0_34 = arith.constant 0 : index
    %44 = vector.load %arg13[%c0_33, %c0_34] : memref<1x256xbf16, #tpu.memory_space<vmem>>, vector<1x256xbf16>
    %45 = vector.broadcast %44 : vector<1x256xbf16> to vector<16x256xbf16>
    %46 = arith.addf %43, %45 : vector<16x256xbf16>
    %cst_35 = arith.constant 0.000000e+00 : bf16
    %47 = vector.broadcast %cst_35 : bf16 to vector<16x256xbf16>
    %48 = arith.maximumf %46, %47 : vector<16x256xbf16>
    %c0_36 = arith.constant 0 : index
    %c0_37 = arith.constant 0 : index
    %49 = vector.load %arg14[%c0_36, %c0_37] : memref<256x128xbf16, #tpu.memory_space<vmem>>, vector<256x128xbf16>
    %cst_38 = arith.constant dense<0.000000e+00> : vector<16x128xf32>
    %50 = tpu.matmul %48, %49, %cst_38 {dimension_numbers = #tpu.dot_dimension_numbers<[1], [0], [0], [1], [0, 0, 1, 1], [], []>} : vector<16x256xbf16>, vector<256x128xbf16>, vector<16x128xf32> -> vector<16x128xf32>
    %51 = arith.truncf %50 : vector<16x128xf32> to vector<16x128xbf16>
    %c0_39 = arith.constant 0 : index
    %c0_40 = arith.constant 0 : index
    %52 = vector.load %arg15[%c0_39, %c0_40] : memref<1x128xbf16, #tpu.memory_space<vmem>>, vector<1x128xbf16>
    %53 = vector.broadcast %52 : vector<1x128xbf16> to vector<16x128xbf16>
    %54 = arith.addf %51, %53 : vector<16x128xbf16>
    %cst_41 = arith.constant 0.000000e+00 : bf16
    %55 = vector.broadcast %cst_41 : bf16 to vector<16x128xbf16>
    %56 = arith.maximumf %54, %55 : vector<16x128xbf16>
    %c0_42 = arith.constant 0 : index
    %c0_43 = arith.constant 0 : index
    %57 = vector.load %arg16[%c0_42, %c0_43] : memref<128x128xbf16, #tpu.memory_space<vmem>>, vector<128x128xbf16>
    %cst_44 = arith.constant dense<0.000000e+00> : vector<16x128xf32>
    %58 = tpu.matmul %56, %57, %cst_44 {dimension_numbers = #tpu.dot_dimension_numbers<[1], [0], [0], [1], [0, 0, 1, 1], [], []>} : vector<16x128xbf16>, vector<128x128xbf16>, vector<16x128xf32> -> vector<16x128xf32>
    %c0_45 = arith.constant 0 : index
    %c0_46 = arith.constant 0 : index
    %59 = vector.load %arg17[%c0_45, %c0_46] : memref<1x128xf32, #tpu.memory_space<vmem>>, vector<1x128xf32>
    %60 = vector.broadcast %59 : vector<1x128xf32> to vector<16x128xf32>
    %61 = arith.addf %58, %60 : vector<16x128xf32>
    %62 = arith.negf %61 : vector<16x128xf32>
    %63 = math.exp %62 : vector<16x128xf32>
    %cst_47 = arith.constant 1.000000e+00 : f32
    %64 = vector.broadcast %cst_47 : f32 to vector<16x128xf32>
    %65 = arith.addf %64, %63 : vector<16x128xf32>
    %66 = arith.divf %64, %65 : vector<16x128xf32>
    %c0_48 = arith.constant 0 : index
    %c0_49 = arith.constant 0 : index
    %67 = vector.load %arg18[%c0_48, %c0_49] : memref<16x128xf32, #tpu.memory_space<vmem>>, vector<16x128xf32>
    tpu.vector_store %arg18[%c0_48, %c0_49], %66 {strides = array<i32>} : memref<16x128xf32, #tpu.memory_space<vmem>>, vector<16x128xf32>,
    return
  }
  func.func @transform_0(%arg0: i32) -> (i32, i32) {
    %c0_i32 = arith.constant 0 : i32
    %c0_i32_0 = arith.constant 0 : i32
    return %arg0, %c0_i32 : i32, i32
  }
  func.func @transform_1(%arg0: i32) -> (i32, i32) {
    %c0_i32 = arith.constant 0 : i32
    %c0_i32_0 = arith.constant 0 : i32
    %c0_i32_1 = arith.constant 0 : i32
    return %c0_i32, %c0_i32_0 : i32, i32
  }
  func.func @transform_2(%arg0: i32) -> (i32, i32) {
    %c0_i32 = arith.constant 0 : i32
    %c0_i32_0 = arith.constant 0 : i32
    %c0_i32_1 = arith.constant 0 : i32
    return %c0_i32, %c0_i32_0 : i32, i32
  }
  func.func @transform_3(%arg0: i32) -> (i32, i32) {
    %c0_i32 = arith.constant 0 : i32
    %c0_i32_0 = arith.constant 0 : i32
    %c0_i32_1 = arith.constant 0 : i32
    return %c0_i32, %c0_i32_0 : i32, i32
  }
  func.func @transform_4(%arg0: i32) -> (i32, i32) {
    %c0_i32 = arith.constant 0 : i32
    %c0_i32_0 = arith.constant 0 : i32
    %c0_i32_1 = arith.constant 0 : i32
    return %c0_i32, %c0_i32_0 : i32, i32
  }
  func.func @transform_5(%arg0: i32) -> (i32, i32) {
    %c0_i32 = arith.constant 0 : i32
    %c0_i32_0 = arith.constant 0 : i32
    %c0_i32_1 = arith.constant 0 : i32
    return %c0_i32, %c0_i32_0 : i32, i32
  }
  func.func @transform_6(%arg0: i32) -> (i32, i32) {
    %c0_i32 = arith.constant 0 : i32
    %c0_i32_0 = arith.constant 0 : i32
    %c0_i32_1 = arith.constant 0 : i32
    return %c0_i32, %c0_i32_0 : i32, i32
  }
  func.func @transform_7(%arg0: i32) -> (i32, i32) {
    %c0_i32 = arith.constant 0 : i32
    %c0_i32_0 = arith.constant 0 : i32
    %c0_i32_1 = arith.constant 0 : i32
    return %c0_i32, %c0_i32_0 : i32, i32
  }
  func.func @transform_8(%arg0: i32) -> (i32, i32) {
    %c0_i32 = arith.constant 0 : i32
    %c0_i32_0 = arith.constant 0 : i32
    %c0_i32_1 = arith.constant 0 : i32
    return %c0_i32, %c0_i32_0 : i32, i32
  }
  func.func @transform_9(%arg0: i32) -> (i32, i32) {
    %c0_i32 = arith.constant 0 : i32
    %c0_i32_0 = arith.constant 0 : i32
    %c0_i32_1 = arith.constant 0 : i32
    return %c0_i32, %c0_i32_0 : i32, i32
  }
  func.func @transform_10(%arg0: i32) -> (i32, i32) {
    %c0_i32 = arith.constant 0 : i32
    %c0_i32_0 = arith.constant 0 : i32
    %c0_i32_1 = arith.constant 0 : i32
    return %c0_i32, %c0_i32_0 : i32, i32
  }
  func.func @transform_11(%arg0: i32) -> (i32, i32) {
    %c0_i32 = arith.constant 0 : i32
    %c0_i32_0 = arith.constant 0 : i32
    %c0_i32_1 = arith.constant 0 : i32
    return %c0_i32, %c0_i32_0 : i32, i32
  }
  func.func @transform_12(%arg0: i32) -> (i32, i32) {
    %c0_i32 = arith.constant 0 : i32
    %c0_i32_0 = arith.constant 0 : i32
    %c0_i32_1 = arith.constant 0 : i32
    return %c0_i32, %c0_i32_0 : i32, i32
  }
  func.func @transform_13(%arg0: i32) -> (i32, i32) {
    %c0_i32 = arith.constant 0 : i32
    %c0_i32_0 = arith.constant 0 : i32
    %c0_i32_1 = arith.constant 0 : i32
    return %c0_i32, %c0_i32_0 : i32, i32
  }
  func.func @transform_14(%arg0: i32) -> (i32, i32) {
    %c0_i32 = arith.constant 0 : i32
    %c0_i32_0 = arith.constant 0 : i32
    %c0_i32_1 = arith.constant 0 : i32
    return %c0_i32, %c0_i32_0 : i32, i32
  }
  func.func @transform_15(%arg0: i32) -> (i32, i32) {
    %c0_i32 = arith.constant 0 : i32
    %c0_i32_0 = arith.constant 0 : i32
    %c0_i32_1 = arith.constant 0 : i32
    return %c0_i32, %c0_i32_0 : i32, i32
  }
  func.func @transform_16(%arg0: i32) -> (i32, i32) {
    %c0_i32 = arith.constant 0 : i32
    %c0_i32_0 = arith.constant 0 : i32
    %c0_i32_1 = arith.constant 0 : i32
    return %c0_i32, %c0_i32_0 : i32, i32
  }
  func.func @transform_17(%arg0: i32) -> (i32, i32) {
    %c0_i32 = arith.constant 0 : i32
    %c0_i32_0 = arith.constant 0 : i32
    return %arg0, %c0_i32 : i32, i32
  }
}

</mosaic_0001>

<bundles_post_ra>
// kernel: fourier_mlp_pallas.1
= control target key start
LH: loop header
LB: loop body
LE: loop exit
PB: predicated region body
PF: predicated region fallthrough
CT: control target
= control target key end

     0   :  { %vm67_vm0 = vcmask 523264   ;;  %v4865_v26 = vmov 0   ;;  %v154_v54 = vlaneseq  ;;  %vm4868_vm1 = vmmov 0   ;;  %s6376_s1 = inlined_call_operand.vmem [shape: f32[64,128], index: 1, kind: input, shape index: {}]   ;;  %s6377_s0 = inlined_call_operand.vmem [shape: f32[16,64], index: 0, kind: input, shape index: {}]   ;;  %s6378_s3 = inlined_call_operand.vmem [shape: bf16[128,256], index: 3, kind: input, shape index: {}]   ;;  %s6379_s5 = inlined_call_operand.vmem [shape: bf16[256,512], index: 5, kind: input, shape index: {}]   ;;  %s6380_s2 = inlined_call_operand.vmem [shape: bf16[1,128], index: 2, kind: input, shape index: {}]   ;;  %s6381_s7 = inlined_call_operand.vmem [shape: bf16[512,512], index: 7, kind: input, shape index: {}]   ;;  %s6382_s4 = inlined_call_operand.vmem [shape: bf16[1,256], index: 4, kind: input, shape index: {}]   ;;  %s6383_s9 = inlined_call_operand.vmem [shape: bf16[512,512], index: 9, kind: input, shape index: {}]   ;;  %s6384_s6 = inlined_call_operand.vmem [shape: bf16[1,512], index: 6, kind: input, shape index: {}]   ;;  %s6385_s8 = inlined_call_operand.vmem [shape: bf16[1,512], index: 8, kind: input, shape index: {}]   ;;  %s6386_s11 = inlined_call_operand.vmem [shape: bf16[512,256], index: 11, kind: input, shape index: {}]   ;;  %s6387_s10 = inlined_call_operand.vmem [shape: bf16[1,512], index: 10, kind: input, shape index: {}]   ;;  %s6388_s13 = inlined_call_operand.vmem [shape: bf16[256,128], index: 13, kind: input, shape index: {}]   ;;  %s6389_s15 = inlined_call_operand.vmem [shape: bf16[128,128], index: 15, kind: input, shape index: {}]   ;;  %s6390_s12 = inlined_call_operand.vmem [shape: bf16[1,256], index: 12, kind: input, shape index: {}]   ;;  %s6391_s14 = inlined_call_operand.vmem [shape: bf16[1,128], index: 14, kind: input, shape index: {}]   ;;  %s6392_s16 = inlined_call_operand.vmem [shape: f32[1,128], index: 16, kind: input, shape index: {}]   ;;  %s6393_s17 = inlined_call_operand.vmem [shape: f32[16,128], index: 17, kind: output, shape index: {}]  }
   0x1   :  { %6396 = sst [smem:[#allocation2_spill]] %s6376_s1  ;;  %v4233_v5 = vld [vmem:[%s6378_s3 + $0x74] ss:$8 sps:$4 sm:$0xff]   ;;  %v4235_v6 = vld [vmem:[%s6378_s3 + $0x70] ss:$8 sps:$4 sm:$0xff]   ;;  %288 = vmatprep.mubr.bf16.mxu1 %v4865_v26 }
   0x2   :  { %6397 = sst [smem:[#allocation3_spill]] %s6377_s0  ;;  %v4236_v7 = vld [vmem:[%s6378_s3 + $0x64] ss:$8 sps:$4 sm:$0xff]   ;;  %256 = vmatprep.subr.bf16.mxu1 %v4233_v5  ;;  %v4238_v9 = vld [vmem:[%s6378_s3 + $0x60] ss:$8 sps:$4 sm:$0xff]   ;;  %v5121_v55 = vshrl.u32 %v154_v54, 7 }
   0x3   :  { %s6398_s26 = sld [smem:[#allocation2_spill]]  ;;  %257 = vmatpush1.bf16.msra.mxu1 %v4235_v6  ;;  %v4239_v11 = vld [vmem:[%s6378_s3 + $0x54] ss:$8 sps:$4 sm:$0xff]   ;;  %v4241_v14 = vld [vmem:[%s6378_s3 + $0x50] ss:$8 sps:$4 sm:$0xff]  }
   0x4   :  { %s6399_s19 = sld [smem:[#allocation3_spill]]  ;;  %258 = vmatprep.subr.bf16.mxu1 %v4236_v7  ;;  %v4242_v15 = vld [vmem:[%s6378_s3 + $0x44] ss:$8 sps:$4 sm:$0xff]   ;;  %v4244_v17 = vld [vmem:[%s6378_s3 + $0x40] ss:$8 sps:$4 sm:$0xff]   ;;  %v5127_v58 = vsub.s32 0, %v5121_v55 }
   0x5   :  { %v4245_v18 = vld [vmem:[%s6378_s3 + $0x34] ss:$8 sps:$4 sm:$0xff]   ;;  %v4247_v19 = vld [vmem:[%s6378_s3 + $0x30] ss:$8 sps:$4 sm:$0xff]   ;;  %v4248_v20 = vld [vmem:[%s6378_s3 + $0x24] ss:$8 sps:$4 sm:$0xff]  }
   0x6   :  { %v4250_v21 = vld [vmem:[%s6378_s3 + $0x20] ss:$8 sps:$4 sm:$0xff]   ;;  %v4251_v22 = vld [vmem:[%s6378_s3 + $0x14] ss:$8 sps:$4 sm:$0xff]   ;;  %v4253_v23 = vld [vmem:[%s6378_s3 + $0x10] ss:$8 sps:$4 sm:$0xff]  }
   0x7   :  { %259 = vmatpush1.bf16.msra.mxu1 %v4238_v9  ;;  %v4254_v24 = vld [vmem:[%s6378_s3 + $0x4] ss:$8 sps:$4 sm:$0xff]   ;;  %v4256_v25 = vld [vmem:[%s6378_s3] ss:$8 sps:$4 sm:$0xff]  }
   0x8   :  { %260 = vmatprep.subr.bf16.mxu1 %v4239_v11  ;;  %v4257_v27 = vld [vmem:[%s6379_s5 + $0xe0] ss:$16 sps:$4 sm:$0xff]   ;;  %v4259_v28 = vld [vmem:[%s6379_s5 + $0xe4] ss:$16 sps:$4 sm:$0xff]   ;;  %v4262_v29 = vld [vmem:[%s6379_s5 + $0xec] ss:$16 sps:$4 sm:$0xff]  }
   0x9   :  { %v66_v0 = vld [vmem:[%s6398_s26 + $0x38] sm:$0xff]  ;;  %v65_v1 = vld [vmem:[%s6398_s26 + $0x30] sm:$0xff]  ;;  %v64_v2 = vld [vmem:[%s6398_s26 + $0x28] sm:$0xff] }
   0xa   :  { %4190 = vmatprep.subr.mxu0 %v66_v0  ;;  %v57_v3 = vld [vmem:[%s6399_s19] sm:$0xff]  ;;  %v62_v8 = vld [vmem:[%s6398_s26 + $0x18] sm:$0xff]  ;;  %v61_v10 = vld [vmem:[%s6398_s26 + $0x10] sm:$0xff] }
   0xb   :  { %4191 = vmatpush3.msra.mxu0 %v66_v0  ;;  %v63_v4 = vld [vmem:[%s6398_s26 + $0x20] sm:$0xff]  ;;  %4206 = vmatprep.mubr.msk.f32.mxu0 %vm67_vm0, %v57_v3  ;;  %v60_v12 = vld [vmem:[%s6398_s26 + $0x8] sm:$0xff] }
   0xc   :  { %4192 = vmatprep.subr.mxu0 %v65_v1  ;;  %v59_v13 = vld [vmem:[%s6398_s26] sm:$0xff]  ;;  %v58_v16 = vld [vmem:[%s6399_s19 + $0x8] sm:$0xff]  ;;  %261 = vmatpush1.bf16.msra.mxu1 %v4241_v14 }
   0xd   :  { %4193 = vmatpush3.msra.mxu0 %v65_v1  ;;  %262 = vmatprep.subr.bf16.mxu1 %v4242_v15  ;;  %v4265_v30 = vld [vmem:[%s6379_s5 + $0xc4] ss:$16 sps:$4 sm:$0xff]   ;;  %v4263_v31 = vld [vmem:[%s6379_s5 + $0xc0] ss:$16 sps:$4 sm:$0xff]   ;;  %v4260_v0 = vld [vmem:[%s6379_s5 + $0xe8] ss:$16 sps:$4 sm:$0xff]  }
   0xe   :  { %4194 = vmatprep.subr.mxu0 %v64_v2  ;;  %v4271_v32 = vld [vmem:[%s6379_s5 + $0xa4] ss:$16 sps:$4 sm:$0xff]   ;;  %v4269_v33 = vld [vmem:[%s6379_s5 + $0xa0] ss:$16 sps:$4 sm:$0xff]   ;;  %v4266_v3 = vld [vmem:[%s6379_s5 + $0xc8] ss:$16 sps:$4 sm:$0xff]  }
   0xf   :  { %4195 = vmatpush3.msra.mxu0 %v64_v2  ;;  %v4277_v34 = vld [vmem:[%s6379_s5 + $0x84] ss:$16 sps:$4 sm:$0xff]   ;;  %v4275_v35 = vld [vmem:[%s6379_s5 + $0x80] ss:$16 sps:$4 sm:$0xff]   ;;  %v4268_v2 = vld [vmem:[%s6379_s5 + $0xcc] ss:$16 sps:$4 sm:$0xff]  }
  0x10   :  { %4196 = vmatprep.subr.mxu0 %v63_v4  ;;  %263 = vmatpush1.bf16.msra.mxu1 %v4244_v17  ;;  %v4283_v36 = vld [vmem:[%s6379_s5 + $0x64] ss:$16 sps:$4 sm:$0xff]   ;;  %v4281_v37 = vld [vmem:[%s6379_s5 + $0x60] ss:$16 sps:$4 sm:$0xff]   ;;  %v4272_v5 = vld [vmem:[%s6379_s5 + $0xa8] ss:$16 sps:$4 sm:$0xff]  }
  0x11   :  { %4197 = vmatpush3.msra.mxu0 %v63_v4  ;;  %264 = vmatprep.subr.bf16.mxu1 %v4245_v18  ;;  %v4289_v38 = vld [vmem:[%s6379_s5 + $0x44] ss:$16 sps:$4 sm:$0xff]   ;;  %v4287_v39 = vld [vmem:[%s6379_s5 + $0x40] ss:$16 sps:$4 sm:$0xff]   ;;  %v4274_v4 = vld [vmem:[%s6379_s5 + $0xac] ss:$16 sps:$4 sm:$0xff]  }
  0x12   :  { %4198 = vmatprep.subr.mxu0 %v62_v8  ;;  %v4295_v40 = vld [vmem:[%s6379_s5 + $0x24] ss:$16 sps:$4 sm:$0xff]   ;;  %v4293_v41 = vld [vmem:[%s6379_s5 + $0x20] ss:$16 sps:$4 sm:$0xff]   ;;  %v4280_v6 = vld [vmem:[%s6379_s5 + $0x8c] ss:$16 sps:$4 sm:$0xff]  }
  0x13   :  { %4199 = vmatpush3.msra.mxu0 %v62_v8  ;;  %v4301_v42 = vld [vmem:[%s6379_s5 + $0x4] ss:$16 sps:$4 sm:$0xff]   ;;  %v4299_v43 = vld [vmem:[%s6379_s5] ss:$16 sps:$4 sm:$0xff]   ;;  %v4278_v7 = vld [vmem:[%s6379_s5 + $0x88] ss:$16 sps:$4 sm:$0xff]  }
  0x14   :  { %4200 = vmatprep.subr.mxu0 %v61_v10  ;;  %265 = vmatpush1.bf16.msra.mxu1 %v4247_v19  ;;  %v4307_v44 = vld [vmem:[%s6379_s5 + $0x1e4] ss:$16 sps:$4 sm:$0xff]   ;;  %v4305_v45 = vld [vmem:[%s6379_s5 + $0x1e0] ss:$16 sps:$4 sm:$0xff]   ;;  %v4286_v8 = vld [vmem:[%s6379_s5 + $0x6c] ss:$16 sps:$4 sm:$0xff]  }
  0x15   :  { %4201 = vmatpush3.msra.mxu0 %v61_v10  ;;  %266 = vmatprep.subr.bf16.mxu1 %v4248_v20  ;;  %v4313_v46 = vld [vmem:[%s6379_s5 + $0x1c4] ss:$16 sps:$4 sm:$0xff]   ;;  %v4311_v47 = vld [vmem:[%s6379_s5 + $0x1c0] ss:$16 sps:$4 sm:$0xff]   ;;  %v4284_v9 = vld [vmem:[%s6379_s5 + $0x68] ss:$16 sps:$4 sm:$0xff]  }
  0x16   :  { %4202 = vmatprep.subr.mxu0 %v60_v12  ;;  %v4319_v48 = vld [vmem:[%s6379_s5 + $0x1a4] ss:$16 sps:$4 sm:$0xff]   ;;  %v4317_v49 = vld [vmem:[%s6379_s5 + $0x1a0] ss:$16 sps:$4 sm:$0xff]   ;;  %v4292_v10 = vld [vmem:[%s6379_s5 + $0x4c] ss:$16 sps:$4 sm:$0xff]  }
  0x17   :  { %4203 = vmatpush3.msra.mxu0 %v60_v12  ;;  %v4325_v50 = vld [vmem:[%s6379_s5 + $0x184] ss:$16 sps:$4 sm:$0xff]   ;;  %v4323_v51 = vld [vmem:[%s6379_s5 + $0x180] ss:$16 sps:$4 sm:$0xff]   ;;  %v4290_v11 = vld [vmem:[%s6379_s5 + $0x48] ss:$16 sps:$4 sm:$0xff]  }
  0x18   :  { %4204 = vmatprep.subr.mxu0 %v59_v13  ;;  %267 = vmatpush1.bf16.msra.mxu1 %v4250_v21  ;;  %v4331_v52 = vld [vmem:[%s6379_s5 + $0x164] ss:$16 sps:$4 sm:$0xff]   ;;  %v4329_v53 = vld [vmem:[%s6379_s5 + $0x160] ss:$16 sps:$4 sm:$0xff]   ;;  %v4298_v12 = vld [vmem:[%s6379_s5 + $0x2c] ss:$16 sps:$4 sm:$0xff]  }
  0x19   :  { %4205 = vmatpush3.msra.mxu0 %v59_v13  ;;  %268 = vmatprep.subr.bf16.mxu1 %v4251_v22  ;;  %v150_v56 = vld [vmem:[%s6380_s2] sm:$0x1]  ;;  %v4296_v13 = vld [vmem:[%s6379_s5 + $0x28] ss:$16 sps:$4 sm:$0xff]   ;;  %v4304_v14 = vld [vmem:[%s6379_s5 + $0xc] ss:$16 sps:$4 sm:$0xff]  }
  0x1a   :  { %4207 = vmatmul.mubr.msk.f32.vlgmr.msra.gmra.mxu0 %vm67_vm0, %v58_v16  ;;  %727 = vmatprep.subr.bf16.mxu0 %v4259_v28  ;;  %v152_v57 = vpack.i.b16 %v150_v56, %v150_v56  ;;  %v4302_v15 = vld [vmem:[%s6379_s5 + $0x8] ss:$16 sps:$4 sm:$0xff]   ;;  %v4310_v16 = vld [vmem:[%s6379_s5 + $0x1ec] ss:$16 sps:$4 sm:$0xff]  }
  0x1b   :  { %728 = vmatpush1.bf16.msra.mxu0 %v4257_v27  ;;  %v4308_v17 = vld [vmem:[%s6379_s5 + $0x1e8] ss:$16 sps:$4 sm:$0xff]   ;;  %v4316_v18 = vld [vmem:[%s6379_s5 + $0x1cc] ss:$16 sps:$4 sm:$0xff]   ;;  %v4337_v27 = vld [vmem:[%s6379_s5 + $0x144] ss:$16 sps:$4 sm:$0xff]  }
  0x1c   :  { %269 = vmatpush1.bf16.msra.mxu1 %v4253_v23  ;;  %729 = vmatprep.subr.bf16.mxu0 %v4265_v30  ;;  %v157_v60 = vrot.slane %v152_v57, %v5127_v58  ;;  %v4314_v19 = vld [vmem:[%s6379_s5 + $0x1c8] ss:$16 sps:$4 sm:$0xff]   ;;  %v4322_v20 = vld [vmem:[%s6379_s5 + $0x1ac] ss:$16 sps:$4 sm:$0xff]  }
  0x1d   :  { %270 = vmatprep.subr.bf16.mxu1 %v4254_v24  ;;  %v4320_v21 = vld [vmem:[%s6379_s5 + $0x1a8] ss:$16 sps:$4 sm:$0xff]   ;;  %v4328_v22 = vld [vmem:[%s6379_s5 + $0x18c] ss:$16 sps:$4 sm:$0xff]  }
  0x1e   :  { %v4326_v23 = vld [vmem:[%s6379_s5 + $0x188] ss:$16 sps:$4 sm:$0xff]   ;;  %v4334_v24 = vld [vmem:[%s6379_s5 + $0x16c] ss:$16 sps:$4 sm:$0xff]  }
  0x1f   :  { %730 = vmatpush1.bf16.msra.mxu0 %v4263_v31  ;;  %v4340_v28 = vld [vmem:[%s6379_s5 + $0x14c] ss:$16 sps:$4 sm:$0xff]   ;;  %v4338_v30 = vld [vmem:[%s6379_s5 + $0x148] ss:$16 sps:$4 sm:$0xff]   ;;  %v4343_v31 = vld [vmem:[%s6379_s5 + $0x124] ss:$16 sps:$4 sm:$0xff]  }
  0x20   :  { %271 = vmatpush1.bf16.msra.mxu1 %v4256_v25  ;;  %731 = vmatprep.subr.bf16.mxu0 %v4271_v32  ;;  %v4332_v25 = vld [vmem:[%s6379_s5 + $0x168] ss:$16 sps:$4 sm:$0xff]   ;;  %v4346_v32 = vld [vmem:[%s6379_s5 + $0x12c] ss:$16 sps:$4 sm:$0xff]  }
  0x21   :  { %770 = vmatprep.subr.bf16.mxu1 %v4262_v29  ;;  %v4335_v29 = vld [vmem:[%s6379_s5 + $0x140] ss:$16 sps:$4 sm:$0xff]  }
  0x23   :  { %732 = vmatpush1.bf16.msra.mxu0 %v4269_v33  ;;  %v4341_v33 = vld [vmem:[%s6379_s5 + $0x120] ss:$16 sps:$4 sm:$0xff]  }
  0x24   :  { %733 = vmatprep.subr.bf16.mxu0 %v4277_v34  ;;  %v4344_v34 = vld [vmem:[%s6379_s5 + $0x128] ss:$16 sps:$4 sm:$0xff]  }
  0x27   :  { %734 = vmatpush1.bf16.msra.mxu0 %v4275_v35  ;;  %v4349_v35 = vld [vmem:[%s6379_s5 + $0x104] ss:$16 sps:$4 sm:$0xff]  }
  0x28   :  { %735 = vmatprep.subr.bf16.mxu0 %v4283_v36  ;;  %v4352_v36 = vld [vmem:[%s6379_s5 + $0x10c] ss:$16 sps:$4 sm:$0xff]  }
  0x2b   :  { %736 = vmatpush1.bf16.msra.mxu0 %v4281_v37  ;;  %v4347_v37 = vld [vmem:[%s6379_s5 + $0x100] ss:$16 sps:$4 sm:$0xff]  }
  0x2c   :  { %737 = vmatprep.subr.bf16.mxu0 %v4289_v38  ;;  %v4350_v38 = vld [vmem:[%s6379_s5 + $0x108] ss:$16 sps:$4 sm:$0xff]  }
  0x2f   :  { %738 = vmatpush1.bf16.msra.mxu0 %v4287_v39  ;;  %v4355_v39 = vld [vmem:[%s6381_s7 + $0xe4] ss:$16 sps:$4 sm:$0xff]  }
  0x30   :  { %739 = vmatprep.subr.bf16.mxu0 %v4295_v40  ;;  %v4358_v40 = vld [vmem:[%s6381_s7 + $0x2e4] ss:$16 sps:$4 sm:$0xff]  }
  0x33   :  { %740 = vmatpush1.bf16.msra.mxu0 %v4293_v41  ;;  %v4866_v41 = vmov 1966171168  }
  0x34   :  { %741 = vmatprep.subr.bf16.mxu0 %v4301_v42  ;;  %v312_v42 = vunpack.c.l.s4 %v4866_v41  ;;  %v4413_v41 = vld [vmem:[%s6381_s7 + $0x1a0] ss:$16 sps:$4 sm:$0xff]  }
  0x37   :  { %742 = vmatpush1.bf16.msra.mxu0 %v4299_v43  ;;  %v313_v43 = vunpack.c.0.s8 %v312_v42  ;;  %v4416_v42 = vld [vmem:[%s6381_s7 + $0x3a0] ss:$16 sps:$4 sm:$0xff]  }
  0x38   :  { %743 = vmatprep.subr.bf16.mxu0 %v4307_v44  ;;  %v3733_v44 = vld.sshfl [vmem:[%s6382_s4] sm:$0x11 pattern:$0x75316420] }
  0x3b   :  { %744 = vmatpush2.bf16.msra.mxu0 %v4305_v45  ;;  %v5252_v45 = vsub.s32 %v313_v43, %v5121_v55  ;;  %v4421_v43 = vld [vmem:[%s6381_s7 + $0x184] ss:$16 sps:$4 sm:$0xff]  }
  0x3c   :  { %745 = vmatprep.subr.bf16.mxu0 %v4313_v46  ;;  %v310_v46 = vcombine.high %v3733_v44, %v3733_v44 }
  0x3f   :  { %746 = vmatpush2.bf16.msra.mxu0 %v4311_v47  ;;  %v317_v47 = vrot.slane %v3733_v44, %v5252_v45  ;;  %v4424_v44 = vld [vmem:[%s6381_s7 + $0x384] ss:$16 sps:$4 sm:$0xff]  }
  0x40   :  { %747 = vmatprep.subr.bf16.mxu0 %v4319_v48  ;;  %v324_v48 = vrot.slane %v310_v46, %v5252_v45  ;;  %v4419_v46 = vld [vmem:[%s6381_s7 + $0x180] ss:$16 sps:$4 sm:$0xff]  }
  0x43   :  { %748 = vmatpush2.bf16.msra.mxu0 %v4317_v49 }
  0x44   :  { %749 = vmatprep.subr.bf16.mxu0 %v4325_v50  ;;  %v326_v50 = vpack.i.b16 %v317_v47, %v317_v47  ;;  %v4422_v47 = vld [vmem:[%s6381_s7 + $0x380] ss:$16 sps:$4 sm:$0xff]  }
  0x46   :  { %v331_v54 = vrot.slane %v326_v50, %v5127_v58  ;;  %v4425_v50 = vld [vmem:[%s6381_s7 + $0x160] ss:$16 sps:$4 sm:$0xff]  }
  0x47   :  { %750 = vmatpush2.bf16.msra.mxu0 %v4323_v51  ;;  %v333_v51 = vpack.i.b16 %v324_v48, %v324_v48  ;;  %v4427_v48 = vld [vmem:[%s6381_s7 + $0x164] ss:$16 sps:$4 sm:$0xff]  }
  0x48   :  { %751 = vmatprep.subr.bf16.mxu0 %v4331_v52 }
  0x49   :  { %v338_v57 = vrot.slane %v333_v51, %v5127_v58  ;;  %v4428_v51 = vld [vmem:[%s6381_s7 + $0x360] ss:$16 sps:$4 sm:$0xff]  }
  0x4b   :  { %752 = vmatpush2.bf16.msra.mxu0 %v4329_v53 }
  0x4c   :  { %753 = vmatprep.subr.bf16.mxu0 %v4337_v27  ;;  %v4397_v27 = vld [vmem:[%s6381_s7 + $0x4] ss:$16 sps:$4 sm:$0xff]  }
  0x4f   :  { %754 = vmatpush2.bf16.msra.mxu0 %v4335_v29  ;;  %v4395_v29 = vld [vmem:[%s6381_s7] ss:$16 sps:$4 sm:$0xff]  }
  0x50   :  { %755 = vmatprep.subr.bf16.mxu0 %v4343_v31  ;;  %v4403_v31 = vld [vmem:[%s6381_s7 + $0x1e4] ss:$16 sps:$4 sm:$0xff]  }
  0x53   :  { %756 = vmatpush2.bf16.msra.mxu0 %v4341_v33  ;;  %v4401_v33 = vld [vmem:[%s6381_s7 + $0x1e0] ss:$16 sps:$4 sm:$0xff]  }
  0x54   :  { %757 = vmatprep.subr.bf16.mxu0 %v4349_v35  ;;  %v4409_v35 = vld [vmem:[%s6381_s7 + $0x1c4] ss:$16 sps:$4 sm:$0xff]  }
  0x57   :  { %758 = vmatpush2.bf16.msra.mxu0 %v4347_v37  ;;  %v4407_v37 = vld [vmem:[%s6381_s7 + $0x1c0] ss:$16 sps:$4 sm:$0xff]  }
  0x58   :  { %1647 = vmatprep.subr.bf16.mxu0 %v4355_v39  ;;  %v4415_v39 = vld [vmem:[%s6381_s7 + $0x1a4] ss:$16 sps:$4 sm:$0xff]  }
  0xda   :  { %v4208_v59 = vpop.f32.mrf.mxu0 }
  0xdc   :  { %v140_v61 = vpop.f32.mrf.mxu0 }
  0xdd   :  { %v149_v62 = vpack.c.bf16 %v4208_v59, %v140_v61 }
  0xdf   :  { %v158_v63 = vadd.bf16 %v157_v60, %v149_v62 }
  0xe1   :  { %v159_v1 = vmax.bf16 %v4865_v26, %v158_v63  ;;  %v4353_v63 = vld [vmem:[%s6381_s7 + $0xe0] ss:$16 sps:$4 sm:$0xff]  }
  0xe3   :  { %289 = vmatmul.mubr.bf16.vlgmr.msra.gmra.mxu1 %v159_v1 }
  0xe4   :  { %771 = vmatpush1.bf16.msra.mxu1 %v4260_v0  ;;  %v4356_v0 = vld [vmem:[%s6381_s7 + $0x2e0] ss:$16 sps:$4 sm:$0xff]  }
  0xe5   :  { %772 = vmatprep.subr.bf16.mxu1 %v4268_v2  ;;  %v4361_v2 = vld [vmem:[%s6381_s7 + $0xc4] ss:$16 sps:$4 sm:$0xff]  }
  0xe8   :  { %773 = vmatpush1.bf16.msra.mxu1 %v4266_v3  ;;  %v4364_v3 = vld [vmem:[%s6381_s7 + $0x2c4] ss:$16 sps:$4 sm:$0xff]  }
  0xe9   :  { %774 = vmatprep.subr.bf16.mxu1 %v4274_v4  ;;  %v4359_v4 = vld [vmem:[%s6381_s7 + $0xc0] ss:$16 sps:$4 sm:$0xff]  }
  0xec   :  { %775 = vmatpush1.bf16.msra.mxu1 %v4272_v5  ;;  %v4362_v5 = vld [vmem:[%s6381_s7 + $0x2c0] ss:$16 sps:$4 sm:$0xff]  }
  0xed   :  { %776 = vmatprep.subr.bf16.mxu1 %v4280_v6  ;;  %v4367_v6 = vld [vmem:[%s6381_s7 + $0xa4] ss:$16 sps:$4 sm:$0xff]  }
  0xf0   :  { %777 = vmatpush1.bf16.msra.mxu1 %v4278_v7  ;;  %v4370_v7 = vld [vmem:[%s6381_s7 + $0x2a4] ss:$16 sps:$4 sm:$0xff]  }
  0xf1   :  { %778 = vmatprep.subr.bf16.mxu1 %v4286_v8  ;;  %v4365_v8 = vld [vmem:[%s6381_s7 + $0xa0] ss:$16 sps:$4 sm:$0xff]  }
  0xf4   :  { %779 = vmatpush1.bf16.msra.mxu1 %v4284_v9  ;;  %v4368_v9 = vld [vmem:[%s6381_s7 + $0x2a0] ss:$16 sps:$4 sm:$0xff]  }
  0xf5   :  { %780 = vmatprep.subr.bf16.mxu1 %v4292_v10  ;;  %v4373_v10 = vld [vmem:[%s6381_s7 + $0x84] ss:$16 sps:$4 sm:$0xff]  }
  0xf8   :  { %781 = vmatpush1.bf16.msra.mxu1 %v4290_v11  ;;  %v4376_v11 = vld [vmem:[%s6381_s7 + $0x284] ss:$16 sps:$4 sm:$0xff]  }
  0xf9   :  { %782 = vmatprep.subr.bf16.mxu1 %v4298_v12  ;;  %v4371_v12 = vld [vmem:[%s6381_s7 + $0x80] ss:$16 sps:$4 sm:$0xff]  }
  0xfc   :  { %783 = vmatpush1.bf16.msra.mxu1 %v4296_v13  ;;  %v4374_v13 = vld [vmem:[%s6381_s7 + $0x280] ss:$16 sps:$4 sm:$0xff]  }
  0xfd   :  { %784 = vmatprep.subr.bf16.mxu1 %v4304_v14  ;;  %v4379_v14 = vld [vmem:[%s6381_s7 + $0x64] ss:$16 sps:$4 sm:$0xff]  }
 0x100   :  { %785 = vmatpush1.bf16.msra.mxu1 %v4302_v15  ;;  %v4382_v15 = vld [vmem:[%s6381_s7 + $0x264] ss:$16 sps:$4 sm:$0xff]  }
 0x101   :  { %786 = vmatprep.subr.bf16.mxu1 %v4310_v16  ;;  %v4377_v16 = vld [vmem:[%s6381_s7 + $0x60] ss:$16 sps:$4 sm:$0xff]  }
 0x104   :  { %787 = vmatpush2.bf16.msra.mxu1 %v4308_v17  ;;  %v4380_v17 = vld [vmem:[%s6381_s7 + $0x260] ss:$16 sps:$4 sm:$0xff]  }
 0x105   :  { %788 = vmatprep.subr.bf16.mxu1 %v4316_v18  ;;  %v4385_v18 = vld [vmem:[%s6381_s7 + $0x44] ss:$16 sps:$4 sm:$0xff]  }
 0x108   :  { %789 = vmatpush2.bf16.msra.mxu1 %v4314_v19  ;;  %v4388_v19 = vld [vmem:[%s6381_s7 + $0x244] ss:$16 sps:$4 sm:$0xff]  }
 0x109   :  { %790 = vmatprep.subr.bf16.mxu1 %v4322_v20  ;;  %v4383_v20 = vld [vmem:[%s6381_s7 + $0x40] ss:$16 sps:$4 sm:$0xff]  }
 0x10c   :  { %791 = vmatpush2.bf16.msra.mxu1 %v4320_v21  ;;  %v4386_v21 = vld [vmem:[%s6381_s7 + $0x240] ss:$16 sps:$4 sm:$0xff]  }
 0x10d   :  { %792 = vmatprep.subr.bf16.mxu1 %v4328_v22  ;;  %v4391_v22 = vld [vmem:[%s6381_s7 + $0x24] ss:$16 sps:$4 sm:$0xff]  }
 0x110   :  { %793 = vmatpush2.bf16.msra.mxu1 %v4326_v23  ;;  %v4394_v23 = vld [vmem:[%s6381_s7 + $0x224] ss:$16 sps:$4 sm:$0xff]  }
 0x111   :  { %794 = vmatprep.subr.bf16.mxu1 %v4334_v24  ;;  %v4389_v24 = vld [vmem:[%s6381_s7 + $0x20] ss:$16 sps:$4 sm:$0xff]  }
 0x114   :  { %795 = vmatpush2.bf16.msra.mxu1 %v4332_v25  ;;  %v4392_v25 = vld [vmem:[%s6381_s7 + $0x220] ss:$16 sps:$4 sm:$0xff]  }
 0x115   :  { %796 = vmatprep.subr.bf16.mxu1 %v4340_v28  ;;  %v4400_v28 = vld [vmem:[%s6381_s7 + $0x204] ss:$16 sps:$4 sm:$0xff]  }
 0x118   :  { %797 = vmatpush2.bf16.msra.mxu1 %v4338_v30  ;;  %v4398_v30 = vld [vmem:[%s6381_s7 + $0x200] ss:$16 sps:$4 sm:$0xff]  }
 0x119   :  { %798 = vmatprep.subr.bf16.mxu1 %v4346_v32  ;;  %v4406_v32 = vld [vmem:[%s6381_s7 + $0x3e4] ss:$16 sps:$4 sm:$0xff]  }
 0x11c   :  { %799 = vmatpush2.bf16.msra.mxu1 %v4344_v34  ;;  %v4404_v34 = vld [vmem:[%s6381_s7 + $0x3e0] ss:$16 sps:$4 sm:$0xff]  }
 0x11d   :  { %800 = vmatprep.subr.bf16.mxu1 %v4352_v36  ;;  %v4412_v36 = vld [vmem:[%s6381_s7 + $0x3c4] ss:$16 sps:$4 sm:$0xff]  }
 0x120   :  { %801 = vmatpush2.bf16.msra.mxu1 %v4350_v38  ;;  %v4410_v38 = vld [vmem:[%s6381_s7 + $0x3c0] ss:$16 sps:$4 sm:$0xff]  }
 0x121   :  { %1690 = vmatprep.subr.bf16.mxu1 %v4358_v40  ;;  %v4418_v40 = vld [vmem:[%s6381_s7 + $0x3a4] ss:$16 sps:$4 sm:$0xff]  }
 0x1a3   :  { %v290_v49 = vpop.f32.mrf.mxu1 }
 0x1a5   :  { %v292_v52 = vpop.f32.mrf.mxu1 }
 0x1a7   :  { %v294_v53 = vpop.f32.mrf.mxu1 }
 0x1a8   :  { %v299_v56 = vpack.c.bf16 %v294_v53, %v290_v49  ;;  %v4430_v49 = vld [vmem:[%s6381_s7 + $0x364] ss:$16 sps:$4 sm:$0xff]  }
 0x1a9   :  { %v296_v59 = vpop.f32.mrf.mxu1  ;;  %v4436_v53 = vld [vmem:[%s6381_s7 + $0x344] ss:$16 sps:$4 sm:$0xff]  }
 0x1aa   :  { %v300_v60 = vpack.c.bf16 %v296_v59, %v292_v52  ;;  %v339_v61 = vadd.bf16 %v331_v54, %v299_v56  ;;  %v4433_v52 = vld [vmem:[%s6381_s7 + $0x144] ss:$16 sps:$4 sm:$0xff]   ;;  %v4431_v54 = vld [vmem:[%s6381_s7 + $0x140] ss:$16 sps:$4 sm:$0xff]  }
 0x1ab   :  { %v4434_v56 = vld [vmem:[%s6381_s7 + $0x340] ss:$16 sps:$4 sm:$0xff]   ;;  %v4442_v59 = vld [vmem:[%s6381_s7 + $0x324] ss:$16 sps:$4 sm:$0xff]  }
 0x1ac   :  { %v340_v55 = vadd.bf16 %v338_v57, %v300_v60  ;;  %v341_v1 = vmax.bf16 %v4865_v26, %v339_v61  ;;  %v4439_v57 = vld [vmem:[%s6381_s7 + $0x124] ss:$16 sps:$4 sm:$0xff]   ;;  %v4437_v60 = vld [vmem:[%s6381_s7 + $0x120] ss:$16 sps:$4 sm:$0xff]  }
 0x1ad   :  { %v4440_v61 = vld [vmem:[%s6381_s7 + $0x320] ss:$16 sps:$4 sm:$0xff]  }
 0x1ae   :  { %v342_v62 = vmax.bf16 %v4865_v26, %v340_v55  ;;  %v4445_v55 = vld [vmem:[%s6381_s7 + $0x104] ss:$16 sps:$4 sm:$0xff]  }
 0x1b0   :  { %759 = vmatprep.mubr.bf16.mxu0 %v342_v62  ;;  %802 = vmatprep.mubr.bf16.mxu1 %v342_v62  ;;  %v4448_v62 = vld [vmem:[%s6381_s7 + $0x304] ss:$16 sps:$4 sm:$0xff]  }
 0x1b1   :  { %760 = vmatmul.mubr.bf16.vlgmr.msra.gmra.mxu0 %v341_v1  ;;  %803 = vmatmul.mubr.bf16.vlgmr.msra.gmra.mxu1 %v341_v1  ;;  %v4451_v1 = vld [vmem:[%s6381_s7 + $0xec] ss:$16 sps:$4 sm:$0xff]  }
 0x1b2   :  { %1648 = vmatpush1.bf16.msra.mxu0 %v4353_v63  ;;  %1691 = vmatpush1.bf16.msra.mxu1 %v4356_v0  ;;  %v4443_v63 = vld [vmem:[%s6381_s7 + $0x100] ss:$16 sps:$4 sm:$0xff]  }
 0x1b3   :  { %1649 = vmatprep.subr.bf16.mxu0 %v4361_v2  ;;  %1692 = vmatprep.subr.bf16.mxu1 %v4364_v3  ;;  %v4446_v0 = vld [vmem:[%s6381_s7 + $0x300] ss:$16 sps:$4 sm:$0xff]   ;;  %v4454_v2 = vld [vmem:[%s6381_s7 + $0x2ec] ss:$16 sps:$4 sm:$0xff]  }
 0x1b4   :  { %v3798_v3 = vld.sshfl [vmem:[%s6384_s6] sm:$0x33 pattern:$0x75316420] }
 0x1b6   :  { %1650 = vmatpush1.bf16.msra.mxu0 %v4359_v4  ;;  %1693 = vmatpush1.bf16.msra.mxu1 %v4362_v5  ;;  %v826_v4 = vcombine.high %v3798_v3, %v3798_v3  ;;  %v833_v5 = vrot.slane %v3798_v3, %v5252_v45  ;;  %v4496_v3 = vld [vmem:[%s6381_s7 + $0x20c] ss:$16 sps:$4 sm:$0xff]  }
 0x1b7   :  { %1651 = vmatprep.subr.bf16.mxu0 %v4367_v6  ;;  %1694 = vmatprep.subr.bf16.mxu1 %v4370_v7 }
 0x1b8   :  { %v840_v6 = vrot.slane %v826_v4, %v5252_v45  ;;  %v841_v7 = vcombine.high %v833_v5, %v833_v5  ;;  %v4491_v4 = vld [vmem:[%s6381_s7 + $0x8] ss:$16 sps:$4 sm:$0xff]  }
 0x1ba   :  { %1652 = vmatpush1.bf16.msra.mxu0 %v4365_v8  ;;  %1695 = vmatpush1.bf16.msra.mxu1 %v4368_v9  ;;  %v842_v8 = vcombine.high %v840_v6, %v840_v6 }
 0x1bb   :  { %1653 = vmatprep.subr.bf16.mxu0 %v4373_v10  ;;  %1696 = vmatprep.subr.bf16.mxu1 %v4376_v11  ;;  %v844_v11 = vpack.i.b16 %v833_v5, %v833_v5  ;;  %v4494_v5 = vld [vmem:[%s6381_s7 + $0x208] ss:$16 sps:$4 sm:$0xff]  }
 0x1be   :  { %1654 = vmatpush1.bf16.msra.mxu0 %v4371_v12  ;;  %1697 = vmatpush1.bf16.msra.mxu1 %v4374_v13  ;;  %v858_v12 = vpack.i.b16 %v841_v7, %v841_v7  ;;  %v851_v13 = vpack.i.b16 %v840_v6, %v840_v6  ;;  %v4499_v6 = vld [vmem:[%s6381_s7 + $0x1ec] ss:$16 sps:$4 sm:$0xff]  }
 0x1bf   :  { %1655 = vmatprep.subr.bf16.mxu0 %v4379_v14  ;;  %1698 = vmatprep.subr.bf16.mxu1 %v4382_v15  ;;  %v865_v14 = vpack.i.b16 %v842_v8, %v842_v8  ;;  %v4502_v7 = vld [vmem:[%s6381_s7 + $0x3ec] ss:$16 sps:$4 sm:$0xff]   ;;  %v4497_v8 = vld [vmem:[%s6381_s7 + $0x1e8] ss:$16 sps:$4 sm:$0xff]  }
 0x1c2   :  { %1656 = vmatpush1.bf16.msra.mxu0 %v4377_v16  ;;  %1699 = vmatpush1.bf16.msra.mxu1 %v4380_v17 }
 0x1c3   :  { %1657 = vmatprep.subr.bf16.mxu0 %v4385_v18  ;;  %1700 = vmatprep.subr.bf16.mxu1 %v4388_v19  ;;  %v849_v18 = vrot.slane %v844_v11, %v5127_v58  ;;  %v4508_v11 = vld [vmem:[%s6381_s7 + $0x3cc] ss:$16 sps:$4 sm:$0xff]  }
 0x1c6   :  { %1658 = vmatpush1.bf16.msra.mxu0 %v4383_v20  ;;  %1701 = vmatpush1.bf16.msra.mxu1 %v4386_v21  ;;  %v863_v20 = vrot.slane %v858_v12, %v5127_v58  ;;  %v4503_v12 = vld [vmem:[%s6381_s7 + $0x1c8] ss:$16 sps:$4 sm:$0xff]  }
 0x1c7   :  { %1659 = vmatprep.subr.bf16.mxu0 %v4391_v22  ;;  %1702 = vmatprep.subr.bf16.mxu1 %v4394_v23  ;;  %v856_v23 = vrot.slane %v851_v13, %v5127_v58  ;;  %v4506_v13 = vld [vmem:[%s6381_s7 + $0x3c8] ss:$16 sps:$4 sm:$0xff]  }
 0x1ca   :  { %1660 = vmatpush1.bf16.msra.mxu0 %v4389_v24  ;;  %1703 = vmatpush1.bf16.msra.mxu1 %v4392_v25  ;;  %v870_v24 = vrot.slane %v865_v14, %v5127_v58  ;;  %v4511_v14 = vld [vmem:[%s6381_s7 + $0x1ac] ss:$16 sps:$4 sm:$0xff]  }
 0x1cb   :  { %1661 = vmatprep.subr.bf16.mxu0 %v4397_v27  ;;  %1704 = vmatprep.subr.bf16.mxu1 %v4400_v28 }
 0x1ce   :  { %1662 = vmatpush1.bf16.msra.mxu0 %v4395_v29  ;;  %1705 = vmatpush1.bf16.msra.mxu1 %v4398_v30 }
 0x1cf   :  { %1663 = vmatprep.subr.bf16.mxu0 %v4403_v31  ;;  %1706 = vmatprep.subr.bf16.mxu1 %v4406_v32 }
 0x1d2   :  { %1664 = vmatpush2.bf16.msra.mxu0 %v4401_v33  ;;  %1707 = vmatpush2.bf16.msra.mxu1 %v4404_v34 }
 0x1d3   :  { %1665 = vmatprep.subr.bf16.mxu0 %v4409_v35  ;;  %1708 = vmatprep.subr.bf16.mxu1 %v4412_v36  ;;  %v4449_v36 = vld [vmem:[%s6381_s7 + $0xe8] ss:$16 sps:$4 sm:$0xff]  }
 0x1d6   :  { %1666 = vmatpush2.bf16.msra.mxu0 %v4407_v37  ;;  %1709 = vmatpush2.bf16.msra.mxu1 %v4410_v38  ;;  %v4452_v37 = vld [vmem:[%s6381_s7 + $0x2e8] ss:$16 sps:$4 sm:$0xff]  }
 0x1d7   :  { %1667 = vmatprep.subr.bf16.mxu0 %v4415_v39  ;;  %1710 = vmatprep.subr.bf16.mxu1 %v4418_v40  ;;  %v4457_v40 = vld [vmem:[%s6381_s7 + $0xcc] ss:$16 sps:$4 sm:$0xff]  }
 0x1da   :  { %1668 = vmatpush2.bf16.msra.mxu0 %v4413_v41  ;;  %1711 = vmatpush2.bf16.msra.mxu1 %v4416_v42  ;;  %v4460_v41 = vld [vmem:[%s6381_s7 + $0x2cc] ss:$16 sps:$4 sm:$0xff]   ;;  %v4455_v42 = vld [vmem:[%s6381_s7 + $0xc8] ss:$16 sps:$4 sm:$0xff]  }
 0x1db   :  { %1669 = vmatprep.subr.bf16.mxu0 %v4421_v43  ;;  %1712 = vmatprep.subr.bf16.mxu1 %v4424_v44  ;;  %v4458_v43 = vld [vmem:[%s6381_s7 + $0x2c8] ss:$16 sps:$4 sm:$0xff]   ;;  %v4463_v44 = vld [vmem:[%s6381_s7 + $0xac] ss:$16 sps:$4 sm:$0xff]  }
 0x1de   :  { %1670 = vmatpush2.bf16.msra.mxu0 %v4419_v46  ;;  %1713 = vmatpush2.bf16.msra.mxu1 %v4422_v47  ;;  %v4466_v46 = vld [vmem:[%s6381_s7 + $0x2ac] ss:$16 sps:$4 sm:$0xff]   ;;  %v4461_v47 = vld [vmem:[%s6381_s7 + $0xa8] ss:$16 sps:$4 sm:$0xff]  }
 0x1df   :  { %1671 = vmatprep.subr.bf16.mxu0 %v4427_v48  ;;  %1714 = vmatprep.subr.bf16.mxu1 %v4430_v49  ;;  %v4464_v48 = vld [vmem:[%s6381_s7 + $0x2a8] ss:$16 sps:$4 sm:$0xff]   ;;  %v4469_v49 = vld [vmem:[%s6381_s7 + $0x8c] ss:$16 sps:$4 sm:$0xff]  }
 0x1e2   :  { %1672 = vmatpush2.bf16.msra.mxu0 %v4425_v50  ;;  %1715 = vmatpush2.bf16.msra.mxu1 %v4428_v51  ;;  %v4472_v50 = vld [vmem:[%s6381_s7 + $0x28c] ss:$16 sps:$4 sm:$0xff]   ;;  %v4467_v51 = vld [vmem:[%s6381_s7 + $0x88] ss:$16 sps:$4 sm:$0xff]  }
 0x1e3   :  { %1673 = vmatprep.subr.bf16.mxu0 %v4433_v52  ;;  %1716 = vmatprep.subr.bf16.mxu1 %v4436_v53  ;;  %v4470_v52 = vld [vmem:[%s6381_s7 + $0x288] ss:$16 sps:$4 sm:$0xff]   ;;  %v4475_v53 = vld [vmem:[%s6381_s7 + $0x6c] ss:$16 sps:$4 sm:$0xff]  }
 0x1e6   :  { %1674 = vmatpush2.bf16.msra.mxu0 %v4431_v54  ;;  %1717 = vmatpush2.bf16.msra.mxu1 %v4434_v56  ;;  %v4478_v54 = vld [vmem:[%s6381_s7 + $0x26c] ss:$16 sps:$4 sm:$0xff]   ;;  %v4473_v56 = vld [vmem:[%s6381_s7 + $0x68] ss:$16 sps:$4 sm:$0xff]  }
 0x1e7   :  { %1675 = vmatprep.subr.bf16.mxu0 %v4439_v57  ;;  %1718 = vmatprep.subr.bf16.mxu1 %v4442_v59  ;;  %v4476_v57 = vld [vmem:[%s6381_s7 + $0x268] ss:$16 sps:$4 sm:$0xff]   ;;  %v4481_v59 = vld [vmem:[%s6381_s7 + $0x4c] ss:$16 sps:$4 sm:$0xff]  }
 0x1ea   :  { %1676 = vmatpush2.bf16.msra.mxu0 %v4437_v60  ;;  %1719 = vmatpush2.bf16.msra.mxu1 %v4440_v61  ;;  %v4484_v60 = vld [vmem:[%s6381_s7 + $0x24c] ss:$16 sps:$4 sm:$0xff]   ;;  %v4479_v61 = vld [vmem:[%s6381_s7 + $0x48] ss:$16 sps:$4 sm:$0xff]  }
 0x1eb   :  { %1677 = vmatprep.subr.bf16.mxu0 %v4445_v55  ;;  %1720 = vmatprep.subr.bf16.mxu1 %v4448_v62  ;;  %v4482_v55 = vld [vmem:[%s6381_s7 + $0x248] ss:$16 sps:$4 sm:$0xff]   ;;  %v4487_v62 = vld [vmem:[%s6381_s7 + $0x2c] ss:$16 sps:$4 sm:$0xff]  }
 0x1ee   :  { %1678 = vmatpush2.bf16.msra.mxu0 %v4443_v63  ;;  %1721 = vmatpush2.bf16.msra.mxu1 %v4446_v0  ;;  %v4490_v63 = vld [vmem:[%s6381_s7 + $0x22c] ss:$16 sps:$4 sm:$0xff]   ;;  %v4485_v0 = vld [vmem:[%s6381_s7 + $0x28] ss:$16 sps:$4 sm:$0xff]  }
 0x1ef   :  { %1733 = vmatprep.subr.bf16.mxu0 %v4451_v1  ;;  %1776 = vmatprep.subr.bf16.mxu1 %v4454_v2  ;;  %v4488_v1 = vld [vmem:[%s6381_s7 + $0x228] ss:$16 sps:$4 sm:$0xff]   ;;  %v4493_v2 = vld [vmem:[%s6381_s7 + $0xc] ss:$16 sps:$4 sm:$0xff]  }
 0x271   :  { %v761_v9 = vpop.f32.mrf.mxu0  ;;  %v804_v10 = vpop.f32.mrf.mxu1 }
 0x273   :  { %v763_v15 = vpop.f32.mrf.mxu0  ;;  %v806_v16 = vpop.f32.mrf.mxu1 }
 0x275   :  { %v765_v17 = vpop.f32.mrf.mxu0  ;;  %v808_v19 = vpop.f32.mrf.mxu1 }
 0x276   :  { %v813_v21 = vpack.c.bf16 %v765_v17, %v761_v9  ;;  %v815_v22 = vpack.c.bf16 %v808_v19, %v804_v10  ;;  %v4500_v9 = vld [vmem:[%s6381_s7 + $0x3e8] ss:$16 sps:$4 sm:$0xff]   ;;  %v4505_v10 = vld [vmem:[%s6381_s7 + $0x1cc] ss:$16 sps:$4 sm:$0xff]  }
 0x277   :  { %v767_v25 = vpop.f32.mrf.mxu0  ;;  %v810_v27 = vpop.f32.mrf.mxu1  ;;  %v4512_v17 = vld [vmem:[%s6381_s7 + $0x3a8] ss:$16 sps:$4 sm:$0xff]   ;;  %v4520_v19 = vld [vmem:[%s6381_s7 + $0x38c] ss:$16 sps:$4 sm:$0xff]  }
 0x278   :  { %v814_v28 = vpack.c.bf16 %v767_v25, %v763_v15  ;;  %v816_v29 = vpack.c.bf16 %v810_v27, %v806_v16  ;;  %v871_v30 = vadd.bf16 %v849_v18, %v813_v21  ;;  %v873_v31 = vadd.bf16 %v863_v20, %v815_v22  ;;  %v4514_v15 = vld [vmem:[%s6381_s7 + $0x3ac] ss:$16 sps:$4 sm:$0xff]   ;;  %v4509_v16 = vld [vmem:[%s6381_s7 + $0x1a8] ss:$16 sps:$4 sm:$0xff]  }
 0x279   :  { %v4517_v18 = vld [vmem:[%s6381_s7 + $0x18c] ss:$16 sps:$4 sm:$0xff]   ;;  %v4515_v20 = vld [vmem:[%s6381_s7 + $0x188] ss:$16 sps:$4 sm:$0xff]  }
 0x27a   :  { %v872_v32 = vadd.bf16 %v856_v23, %v814_v28  ;;  %v874_v33 = vadd.bf16 %v870_v24, %v816_v29  ;;  %v5470_v38 = vmax.bf16 %v4865_v26, %v871_v30  ;;  %v5473_v39 = vmax.bf16 %v4865_v26, %v873_v31  ;;  %v4518_v21 = vld [vmem:[%s6381_s7 + $0x388] ss:$16 sps:$4 sm:$0xff]   ;;  %v4523_v22 = vld [vmem:[%s6381_s7 + $0x16c] ss:$16 sps:$4 sm:$0xff]  }
 0x27b   :  { %v4526_v23 = vld [vmem:[%s6381_s7 + $0x36c] ss:$16 sps:$4 sm:$0xff]   ;;  %v4521_v24 = vld [vmem:[%s6381_s7 + $0x168] ss:$16 sps:$4 sm:$0xff]  }
 0x27c   :  { %v876_v34 = vmax.bf16 %v4865_v26, %v872_v32  ;;  %v878_v35 = vmax.bf16 %v4865_v26, %v874_v33  ;;  %v4524_v25 = vld [vmem:[%s6381_s7 + $0x368] ss:$16 sps:$4 sm:$0xff]   ;;  %v4529_v27 = vld [vmem:[%s6381_s7 + $0x14c] ss:$16 sps:$4 sm:$0xff]  }
 0x27d   :  { %v4532_v28 = vld [vmem:[%s6381_s7 + $0x34c] ss:$16 sps:$4 sm:$0xff]   ;;  %v4527_v29 = vld [vmem:[%s6381_s7 + $0x148] ss:$16 sps:$4 sm:$0xff]  }
 0x27e   :  { %1679 = vmatprep.mubr.bf16.mxu0 %v876_v34  ;;  %1722 = vmatprep.mubr.bf16.mxu1 %v878_v35  ;;  %v4530_v30 = vld [vmem:[%s6381_s7 + $0x348] ss:$16 sps:$4 sm:$0xff]   ;;  %v4535_v31 = vld [vmem:[%s6381_s7 + $0x12c] ss:$16 sps:$4 sm:$0xff]  }
 0x27f   :  { %1680 = vmatmul.mubr.bf16.vlgmr.msra.gmra.mxu0 %v5470_v38  ;;  %1723 = vmatmul.mubr.bf16.vlgmr.msra.gmra.mxu1 %v5473_v39  ;;  %v4538_v32 = vld [vmem:[%s6381_s7 + $0x32c] ss:$16 sps:$4 sm:$0xff]   ;;  %v4533_v33 = vld [vmem:[%s6381_s7 + $0x128] ss:$16 sps:$4 sm:$0xff]  }
 0x280   :  { %1734 = vmatpush1.bf16.msra.mxu0 %v4449_v36  ;;  %1777 = vmatpush1.bf16.msra.mxu1 %v4452_v37  ;;  %v4544_v36 = vld [vmem:[%s6381_s7 + $0x30c] ss:$16 sps:$4 sm:$0xff]   ;;  %v4539_v37 = vld [vmem:[%s6381_s7 + $0x108] ss:$16 sps:$4 sm:$0xff]  }
 0x281   :  { %1765 = vmatprep.mubr.bf16.mxu0 %v876_v34  ;;  %1808 = vmatprep.mubr.bf16.mxu1 %v878_v35  ;;  %v4536_v34 = vld [vmem:[%s6381_s7 + $0x328] ss:$16 sps:$4 sm:$0xff]   ;;  %v4541_v35 = vld [vmem:[%s6381_s7 + $0x10c] ss:$16 sps:$4 sm:$0xff]  }
 0x282   :  { %1735 = vmatprep.subr.bf16.mxu0 %v4457_v40  ;;  %1778 = vmatprep.subr.bf16.mxu1 %v4460_v41  ;;  %v4542_v40 = vld [vmem:[%s6381_s7 + $0x308] ss:$16 sps:$4 sm:$0xff]   ;;  %v4547_v41 = vld [vmem:[%s6383_s9 + $0xe4] ss:$16 sps:$4 sm:$0xff]  }
 0x284   :  { %1736 = vmatpush1.bf16.msra.mxu0 %v4455_v42  ;;  %1779 = vmatpush1.bf16.msra.mxu1 %v4458_v43  ;;  %v4545_v42 = vld [vmem:[%s6383_s9 + $0xe0] ss:$16 sps:$4 sm:$0xff]   ;;  %v4550_v43 = vld [vmem:[%s6383_s9 + $0xc4] ss:$16 sps:$4 sm:$0xff]  }
 0x285   :  { %1737 = vmatprep.subr.bf16.mxu0 %v4463_v44  ;;  %1780 = vmatprep.subr.bf16.mxu1 %v4466_v46  ;;  %v4548_v44 = vld [vmem:[%s6383_s9 + $0xc0] ss:$16 sps:$4 sm:$0xff]   ;;  %v4553_v46 = vld [vmem:[%s6383_s9 + $0xa4] ss:$16 sps:$4 sm:$0xff]  }
 0x288   :  { %1738 = vmatpush1.bf16.msra.mxu0 %v4461_v47  ;;  %1781 = vmatpush1.bf16.msra.mxu1 %v4464_v48  ;;  %v4551_v47 = vld [vmem:[%s6383_s9 + $0xa0] ss:$16 sps:$4 sm:$0xff]   ;;  %v4559_v48 = vld [vmem:[%s6383_s9 + $0x64] ss:$16 sps:$4 sm:$0xff]  }
 0x289   :  { %1739 = vmatprep.subr.bf16.mxu0 %v4469_v49  ;;  %1782 = vmatprep.subr.bf16.mxu1 %v4472_v50  ;;  %v4593_v49 = vld [vmem:[%s6383_s9 + $0x2e0] ss:$16 sps:$4 sm:$0xff]   ;;  %v4595_v50 = vld [vmem:[%s6383_s9 + $0x2e4] ss:$16 sps:$4 sm:$0xff]  }
 0x28c   :  { %1740 = vmatpush1.bf16.msra.mxu0 %v4467_v51  ;;  %1783 = vmatpush1.bf16.msra.mxu1 %v4470_v52  ;;  %v4557_v51 = vld [vmem:[%s6383_s9 + $0x60] ss:$16 sps:$4 sm:$0xff]   ;;  %v4562_v52 = vld [vmem:[%s6383_s9 + $0x44] ss:$16 sps:$4 sm:$0xff]  }
 0x28d   :  { %1741 = vmatprep.subr.bf16.mxu0 %v4475_v53  ;;  %1784 = vmatprep.subr.bf16.mxu1 %v4478_v54  ;;  %v4560_v53 = vld [vmem:[%s6383_s9 + $0x40] ss:$16 sps:$4 sm:$0xff]  }
 0x28e   :  { %v4599_v54 = vld [vmem:[%s6383_s9 + $0x2c0] ss:$16 sps:$4 sm:$0xff]  }
 0x290   :  { %1742 = vmatpush1.bf16.msra.mxu0 %v4473_v56  ;;  %1785 = vmatpush1.bf16.msra.mxu1 %v4476_v57  ;;  %v4601_v56 = vld [vmem:[%s6383_s9 + $0x2c4] ss:$16 sps:$4 sm:$0xff]  }
 0x291   :  { %1743 = vmatprep.subr.bf16.mxu0 %v4481_v59  ;;  %1786 = vmatprep.subr.bf16.mxu1 %v4484_v60  ;;  %v4565_v57 = vld [vmem:[%s6383_s9 + $0x24] ss:$16 sps:$4 sm:$0xff]   ;;  %v4563_v59 = vld [vmem:[%s6383_s9 + $0x20] ss:$16 sps:$4 sm:$0xff]  }
 0x292   :  { %v4605_v60 = vld [vmem:[%s6383_s9 + $0x2a0] ss:$16 sps:$4 sm:$0xff]  }
 0x294   :  { %1744 = vmatpush1.bf16.msra.mxu0 %v4479_v61  ;;  %1787 = vmatpush1.bf16.msra.mxu1 %v4482_v55  ;;  %v4607_v61 = vld [vmem:[%s6383_s9 + $0x2a4] ss:$16 sps:$4 sm:$0xff]  }
 0x295   :  { %1745 = vmatprep.subr.bf16.mxu0 %v4487_v62  ;;  %1788 = vmatprep.subr.bf16.mxu1 %v4490_v63  ;;  %v4568_v55 = vld [vmem:[%s6383_s9 + $0x4] ss:$16 sps:$4 sm:$0xff]   ;;  %v4566_v62 = vld [vmem:[%s6383_s9] ss:$16 sps:$4 sm:$0xff]  }
 0x296   :  { %v4611_v63 = vld [vmem:[%s6383_s9 + $0x280] ss:$16 sps:$4 sm:$0xff]  }
 0x298   :  { %1746 = vmatpush1.bf16.msra.mxu0 %v4485_v0  ;;  %1789 = vmatpush1.bf16.msra.mxu1 %v4488_v1  ;;  %v4613_v0 = vld [vmem:[%s6383_s9 + $0x284] ss:$16 sps:$4 sm:$0xff]  }
 0x299   :  { %1747 = vmatprep.subr.bf16.mxu0 %v4493_v2  ;;  %1790 = vmatprep.subr.bf16.mxu1 %v4496_v3  ;;  %v4571_v1 = vld [vmem:[%s6383_s9 + $0x1e4] ss:$16 sps:$4 sm:$0xff]   ;;  %v4569_v2 = vld [vmem:[%s6383_s9 + $0x1e0] ss:$16 sps:$4 sm:$0xff]  }
 0x29a   :  { %v4617_v3 = vld [vmem:[%s6383_s9 + $0x260] ss:$16 sps:$4 sm:$0xff]  }
 0x29c   :  { %1748 = vmatpush1.bf16.msra.mxu0 %v4491_v4  ;;  %1791 = vmatpush1.bf16.msra.mxu1 %v4494_v5  ;;  %v4619_v4 = vld [vmem:[%s6383_s9 + $0x264] ss:$16 sps:$4 sm:$0xff]  }
 0x29d   :  { %1749 = vmatprep.subr.bf16.mxu0 %v4499_v6  ;;  %1792 = vmatprep.subr.bf16.mxu1 %v4502_v7  ;;  %v4574_v5 = vld [vmem:[%s6383_s9 + $0x1c4] ss:$16 sps:$4 sm:$0xff]   ;;  %v4572_v6 = vld [vmem:[%s6383_s9 + $0x1c0] ss:$16 sps:$4 sm:$0xff]  }
 0x29e   :  { %v4623_v7 = vld [vmem:[%s6383_s9 + $0x240] ss:$16 sps:$4 sm:$0xff]  }
 0x2a0   :  { %1750 = vmatpush2.bf16.msra.mxu0 %v4497_v8  ;;  %1793 = vmatpush2.bf16.msra.mxu1 %v4500_v9  ;;  %v4625_v8 = vld [vmem:[%s6383_s9 + $0x244] ss:$16 sps:$4 sm:$0xff]  }
 0x2a1   :  { %1751 = vmatprep.subr.bf16.mxu0 %v4505_v10  ;;  %1794 = vmatprep.subr.bf16.mxu1 %v4508_v11  ;;  %v4577_v9 = vld [vmem:[%s6383_s9 + $0x1a4] ss:$16 sps:$4 sm:$0xff]   ;;  %v4575_v10 = vld [vmem:[%s6383_s9 + $0x1a0] ss:$16 sps:$4 sm:$0xff]  }
 0x2a2   :  { %v4629_v11 = vld [vmem:[%s6383_s9 + $0x220] ss:$16 sps:$4 sm:$0xff]  }
 0x2a4   :  { %1752 = vmatpush2.bf16.msra.mxu0 %v4503_v12  ;;  %1795 = vmatpush2.bf16.msra.mxu1 %v4506_v13  ;;  %v4631_v12 = vld [vmem:[%s6383_s9 + $0x224] ss:$16 sps:$4 sm:$0xff]  }
 0x2a5   :  { %1753 = vmatprep.subr.bf16.mxu0 %v4511_v14  ;;  %1796 = vmatprep.subr.bf16.mxu1 %v4514_v15  ;;  %v4580_v13 = vld [vmem:[%s6383_s9 + $0x184] ss:$16 sps:$4 sm:$0xff]   ;;  %v4578_v14 = vld [vmem:[%s6383_s9 + $0x180] ss:$16 sps:$4 sm:$0xff]  }
 0x2a6   :  { %v4635_v15 = vld [vmem:[%s6383_s9 + $0x200] ss:$16 sps:$4 sm:$0xff]  }
 0x2a8   :  { %1754 = vmatpush2.bf16.msra.mxu0 %v4509_v16  ;;  %1797 = vmatpush2.bf16.msra.mxu1 %v4512_v17  ;;  %v4637_v16 = vld [vmem:[%s6383_s9 + $0x204] ss:$16 sps:$4 sm:$0xff]  }
 0x2a9   :  { %1755 = vmatprep.subr.bf16.mxu0 %v4517_v18  ;;  %1798 = vmatprep.subr.bf16.mxu1 %v4520_v19  ;;  %v4583_v17 = vld [vmem:[%s6383_s9 + $0x164] ss:$16 sps:$4 sm:$0xff]   ;;  %v4581_v18 = vld [vmem:[%s6383_s9 + $0x160] ss:$16 sps:$4 sm:$0xff]  }
 0x2aa   :  { %v4641_v19 = vld [vmem:[%s6383_s9 + $0x3e0] ss:$16 sps:$4 sm:$0xff]  }
 0x2ac   :  { %1756 = vmatpush2.bf16.msra.mxu0 %v4515_v20  ;;  %1799 = vmatpush2.bf16.msra.mxu1 %v4518_v21  ;;  %v4643_v20 = vld [vmem:[%s6383_s9 + $0x3e4] ss:$16 sps:$4 sm:$0xff]  }
 0x2ad   :  { %1757 = vmatprep.subr.bf16.mxu0 %v4523_v22  ;;  %1800 = vmatprep.subr.bf16.mxu1 %v4526_v23  ;;  %v4586_v21 = vld [vmem:[%s6383_s9 + $0x144] ss:$16 sps:$4 sm:$0xff]   ;;  %v4584_v22 = vld [vmem:[%s6383_s9 + $0x140] ss:$16 sps:$4 sm:$0xff]  }
 0x2ae   :  { %v4647_v23 = vld [vmem:[%s6383_s9 + $0x3c0] ss:$16 sps:$4 sm:$0xff]  }
 0x2b0   :  { %1758 = vmatpush2.bf16.msra.mxu0 %v4521_v24  ;;  %1801 = vmatpush2.bf16.msra.mxu1 %v4524_v25  ;;  %v4649_v24 = vld [vmem:[%s6383_s9 + $0x3c4] ss:$16 sps:$4 sm:$0xff]  }
 0x2b1   :  { %1759 = vmatprep.subr.bf16.mxu0 %v4529_v27  ;;  %1802 = vmatprep.subr.bf16.mxu1 %v4532_v28  ;;  %v4589_v25 = vld [vmem:[%s6383_s9 + $0x124] ss:$16 sps:$4 sm:$0xff]   ;;  %v4587_v27 = vld [vmem:[%s6383_s9 + $0x120] ss:$16 sps:$4 sm:$0xff]  }
 0x2b2   :  { %v4653_v28 = vld [vmem:[%s6383_s9 + $0x3a0] ss:$16 sps:$4 sm:$0xff]  }
 0x2b4   :  { %1760 = vmatpush2.bf16.msra.mxu0 %v4527_v29  ;;  %1803 = vmatpush2.bf16.msra.mxu1 %v4530_v30  ;;  %v4655_v29 = vld [vmem:[%s6383_s9 + $0x3a4] ss:$16 sps:$4 sm:$0xff]  }
 0x2b5   :  { %1761 = vmatprep.subr.bf16.mxu0 %v4535_v31  ;;  %1804 = vmatprep.subr.bf16.mxu1 %v4538_v32  ;;  %v4592_v30 = vld [vmem:[%s6383_s9 + $0x104] ss:$16 sps:$4 sm:$0xff]   ;;  %v4590_v31 = vld [vmem:[%s6383_s9 + $0x100] ss:$16 sps:$4 sm:$0xff]  }
 0x2b6   :  { %v4659_v32 = vld [vmem:[%s6383_s9 + $0x380] ss:$16 sps:$4 sm:$0xff]  }
 0x2b8   :  { %1762 = vmatpush2.bf16.msra.mxu0 %v4533_v33  ;;  %1805 = vmatpush2.bf16.msra.mxu1 %v4536_v34  ;;  %v4661_v33 = vld [vmem:[%s6383_s9 + $0x384] ss:$16 sps:$4 sm:$0xff]   ;;  %v4598_v34 = vld [vmem:[%s6383_s9 + $0xec] ss:$16 sps:$4 sm:$0xff]  }
 0x2b9   :  { %1763 = vmatprep.subr.bf16.mxu0 %v4541_v35  ;;  %1806 = vmatprep.subr.bf16.mxu1 %v4544_v36  ;;  %v4665_v35 = vld [vmem:[%s6383_s9 + $0x360] ss:$16 sps:$4 sm:$0xff]   ;;  %v4667_v36 = vld [vmem:[%s6383_s9 + $0x364] ss:$16 sps:$4 sm:$0xff]  }
 0x2bc   :  { %1764 = vmatpush2.bf16.msra.mxu0 %v4539_v37  ;;  %1807 = vmatpush2.bf16.msra.mxu1 %v4542_v40  ;;  %v4673_v37 = vld [vmem:[%s6383_s9 + $0x344] ss:$16 sps:$4 sm:$0xff]   ;;  %v4671_v40 = vld [vmem:[%s6383_s9 + $0x340] ss:$16 sps:$4 sm:$0xff]  }
 0x2bd   :  { %2653 = vmatprep.subr.bf16.mxu0 %v4547_v41  ;;  %2696 = vmatprep.subr.bf16.mxu1 %v4595_v50  ;;  %v4679_v41 = vld [vmem:[%s6383_s9 + $0x324] ss:$16 sps:$4 sm:$0xff]  }
 0x2bf   :  { %1766 = vmatmul.mubr.bf16.vlgmr.msra.gmra.mxu0 %v5470_v38  ;;  %1809 = vmatmul.mubr.bf16.vlgmr.msra.gmra.mxu1 %v5473_v39  ;;  %v4556_v38 = vld [vmem:[%s6383_s9 + $0x84] ss:$16 sps:$4 sm:$0xff]   ;;  %v4554_v39 = vld [vmem:[%s6383_s9 + $0x80] ss:$16 sps:$4 sm:$0xff]  }
 0x2c0   :  { %2654 = vmatpush1.bf16.msra.mxu0 %v4545_v42  ;;  %2697 = vmatpush1.bf16.msra.mxu1 %v4593_v49  ;;  %v4677_v42 = vld [vmem:[%s6383_s9 + $0x320] ss:$16 sps:$4 sm:$0xff]  }
 0x2c1   :  { %2655 = vmatprep.subr.bf16.mxu0 %v4550_v43  ;;  %2698 = vmatprep.subr.bf16.mxu1 %v4601_v56  ;;  %v4685_v43 = vld [vmem:[%s6383_s9 + $0x304] ss:$16 sps:$4 sm:$0xff]  }
 0x2c4   :  { %2656 = vmatpush1.bf16.msra.mxu0 %v4548_v44  ;;  %2699 = vmatpush1.bf16.msra.mxu1 %v4599_v54  ;;  %v4683_v44 = vld [vmem:[%s6383_s9 + $0x300] ss:$16 sps:$4 sm:$0xff]  }
 0x2c5   :  { %2657 = vmatprep.subr.bf16.mxu0 %v4553_v46  ;;  %2700 = vmatprep.subr.bf16.mxu1 %v4607_v61  ;;  %v4691_v46 = vld [vmem:[%s6383_s9 + $0x2ec] ss:$16 sps:$4 sm:$0xff]  }
 0x2c8   :  { %2658 = vmatpush1.bf16.msra.mxu0 %v4551_v47  ;;  %2701 = vmatpush1.bf16.msra.mxu1 %v4605_v60  ;;  %v3927_v47 = vld.sshfl [vmem:[%s6385_s8] sm:$0x33 pattern:$0x75316420] }
 0x2c9   :  { %2659 = vmatprep.subr.bf16.mxu0 %v4556_v38  ;;  %2702 = vmatprep.subr.bf16.mxu1 %v4613_v0  ;;  %v1832_v38 = vcombine.high %v3927_v47, %v3927_v47 }
 0x2cc   :  { %2660 = vmatpush1.bf16.msra.mxu0 %v4554_v39  ;;  %2703 = vmatpush1.bf16.msra.mxu1 %v4611_v63  ;;  %v5861_v39 = vrot.slane %v3927_v47, %v5252_v45 }
 0x2cd   :  { %2661 = vmatprep.subr.bf16.mxu0 %v4559_v48  ;;  %2704 = vmatprep.subr.bf16.mxu1 %v4619_v4  ;;  %v5864_v48 = vrot.slane %v1832_v38, %v5252_v45 }
 0x2cf   :  { %v1857_v54 = vpack.i.b16 %v5864_v48, %v5864_v48 }
 0x2d0   :  { %2662 = vmatpush1.bf16.msra.mxu0 %v4557_v51  ;;  %2705 = vmatpush1.bf16.msra.mxu1 %v4617_v3 }
 0x2d1   :  { %2663 = vmatprep.subr.bf16.mxu0 %v4562_v52  ;;  %2706 = vmatprep.subr.bf16.mxu1 %v4625_v8 }
 0x2d4   :  { %2664 = vmatpush1.bf16.msra.mxu0 %v4560_v53  ;;  %2707 = vmatpush1.bf16.msra.mxu1 %v4623_v7  ;;  %v1850_v53 = vpack.i.b16 %v5861_v39, %v5861_v39  ;;  %v4596_v7 = vld [vmem:[%s6383_s9 + $0xe8] ss:$16 sps:$4 sm:$0xff]  }
 0x2d5   :  { %2665 = vmatprep.subr.bf16.mxu0 %v4565_v57  ;;  %2708 = vmatprep.subr.bf16.mxu1 %v4631_v12  ;;  %v4608_v12 = vld [vmem:[%s6383_s9 + $0xa8] ss:$16 sps:$4 sm:$0xff]  }
 0x2d6   :  { %v1855_v61 = vrot.slane %v1850_v53, %v5127_v58 }
 0x2d8   :  { %2666 = vmatpush1.bf16.msra.mxu0 %v4563_v59  ;;  %2709 = vmatpush1.bf16.msra.mxu1 %v4629_v11  ;;  %v4610_v11 = vld [vmem:[%s6383_s9 + $0xac] ss:$16 sps:$4 sm:$0xff]  }
 0x2d9   :  { %2667 = vmatprep.subr.bf16.mxu0 %v4568_v55  ;;  %2710 = vmatprep.subr.bf16.mxu1 %v4637_v16  ;;  %v4620_v16 = vld [vmem:[%s6383_s9 + $0x68] ss:$16 sps:$4 sm:$0xff]  }
 0x2dc   :  { %2668 = vmatpush1.bf16.msra.mxu0 %v4566_v62  ;;  %2711 = vmatpush1.bf16.msra.mxu1 %v4635_v15  ;;  %v4622_v15 = vld [vmem:[%s6383_s9 + $0x6c] ss:$16 sps:$4 sm:$0xff]  }
 0x2dd   :  { %2669 = vmatprep.subr.bf16.mxu0 %v4571_v1  ;;  %2712 = vmatprep.subr.bf16.mxu1 %v4643_v20  ;;  %v4632_v20 = vld [vmem:[%s6383_s9 + $0x28] ss:$16 sps:$4 sm:$0xff]  }
 0x2e0   :  { %2670 = vmatpush2.bf16.msra.mxu0 %v4569_v2  ;;  %2713 = vmatpush2.bf16.msra.mxu1 %v4641_v19  ;;  %v1862_v2 = vrot.slane %v1857_v54, %v5127_v58  ;;  %v4634_v19 = vld [vmem:[%s6383_s9 + $0x2c] ss:$16 sps:$4 sm:$0xff]  }
 0x2e1   :  { %2671 = vmatprep.subr.bf16.mxu0 %v4574_v5  ;;  %2714 = vmatprep.subr.bf16.mxu1 %v4649_v24  ;;  %v4644_v24 = vld [vmem:[%s6383_s9 + $0x1e8] ss:$16 sps:$4 sm:$0xff]   ;;  %v4688_v54 = vld [vmem:[%s6383_s9 + $0x10c] ss:$16 sps:$4 sm:$0xff]  }
 0x2e4   :  { %2672 = vmatpush2.bf16.msra.mxu0 %v4572_v6  ;;  %2715 = vmatpush2.bf16.msra.mxu1 %v4647_v23  ;;  %v4646_v23 = vld [vmem:[%s6383_s9 + $0x1ec] ss:$16 sps:$4 sm:$0xff]  }
 0x2e5   :  { %2673 = vmatprep.subr.bf16.mxu0 %v4577_v9  ;;  %2716 = vmatprep.subr.bf16.mxu1 %v4655_v29  ;;  %v4604_v9 = vld [vmem:[%s6383_s9 + $0xcc] ss:$16 sps:$4 sm:$0xff]   ;;  %v4656_v29 = vld [vmem:[%s6383_s9 + $0x1a8] ss:$16 sps:$4 sm:$0xff]  }
 0x2e8   :  { %2674 = vmatpush2.bf16.msra.mxu0 %v4575_v10  ;;  %2717 = vmatpush2.bf16.msra.mxu1 %v4653_v28  ;;  %v4602_v10 = vld [vmem:[%s6383_s9 + $0xc8] ss:$16 sps:$4 sm:$0xff]   ;;  %v4658_v28 = vld [vmem:[%s6383_s9 + $0x1ac] ss:$16 sps:$4 sm:$0xff]  }
 0x2e9   :  { %2675 = vmatprep.subr.bf16.mxu0 %v4580_v13  ;;  %2718 = vmatprep.subr.bf16.mxu1 %v4661_v33  ;;  %v4616_v13 = vld [vmem:[%s6383_s9 + $0x8c] ss:$16 sps:$4 sm:$0xff]   ;;  %v4668_v33 = vld [vmem:[%s6383_s9 + $0x168] ss:$16 sps:$4 sm:$0xff]  }
 0x2ec   :  { %2676 = vmatpush2.bf16.msra.mxu0 %v4578_v14  ;;  %2719 = vmatpush2.bf16.msra.mxu1 %v4659_v32  ;;  %v4614_v14 = vld [vmem:[%s6383_s9 + $0x88] ss:$16 sps:$4 sm:$0xff]   ;;  %v4670_v32 = vld [vmem:[%s6383_s9 + $0x16c] ss:$16 sps:$4 sm:$0xff]  }
 0x2ed   :  { %2677 = vmatprep.subr.bf16.mxu0 %v4583_v17  ;;  %2720 = vmatprep.subr.bf16.mxu1 %v4667_v36  ;;  %v4628_v17 = vld [vmem:[%s6383_s9 + $0x4c] ss:$16 sps:$4 sm:$0xff]   ;;  %v1848_v36 = vcombine.high %v5864_v48, %v5864_v48 }
 0x2ef   :  { %v1871_v47 = vpack.i.b16 %v1848_v36, %v1848_v36  ;;  %v4716_v36 = vld [vmem:[%s6383_s9 + $0x3c8] ss:$16 sps:$4 sm:$0xff]  }
 0x2f0   :  { %2678 = vmatpush2.bf16.msra.mxu0 %v4581_v18  ;;  %2721 = vmatpush2.bf16.msra.mxu1 %v4665_v35  ;;  %v4626_v18 = vld [vmem:[%s6383_s9 + $0x48] ss:$16 sps:$4 sm:$0xff]   ;;  %v4676_v35 = vld [vmem:[%s6383_s9 + $0x14c] ss:$16 sps:$4 sm:$0xff]  }
 0x2f1   :  { %2679 = vmatprep.subr.bf16.mxu0 %v4586_v21  ;;  %2722 = vmatprep.subr.bf16.mxu1 %v4673_v37  ;;  %v4640_v21 = vld [vmem:[%s6383_s9 + $0xc] ss:$16 sps:$4 sm:$0xff]  }
 0x2f4   :  { %2680 = vmatpush2.bf16.msra.mxu0 %v4584_v22  ;;  %2723 = vmatpush2.bf16.msra.mxu1 %v4671_v40  ;;  %v4638_v22 = vld [vmem:[%s6383_s9 + $0x8] ss:$16 sps:$4 sm:$0xff]  }
 0x2f5   :  { %2681 = vmatprep.subr.bf16.mxu0 %v4589_v25  ;;  %2724 = vmatprep.subr.bf16.mxu1 %v4679_v41  ;;  %v4652_v25 = vld [vmem:[%s6383_s9 + $0x1cc] ss:$16 sps:$4 sm:$0xff]   ;;  %v4674_v41 = vld [vmem:[%s6383_s9 + $0x148] ss:$16 sps:$4 sm:$0xff]  }
 0x2f8   :  { %2682 = vmatpush2.bf16.msra.mxu0 %v4587_v27  ;;  %2725 = vmatpush2.bf16.msra.mxu1 %v4677_v42  ;;  %v4650_v27 = vld [vmem:[%s6383_s9 + $0x1c8] ss:$16 sps:$4 sm:$0xff]  }
 0x2f9   :  { %2683 = vmatprep.subr.bf16.mxu0 %v4592_v30  ;;  %2726 = vmatprep.subr.bf16.mxu1 %v4685_v43  ;;  %v4664_v30 = vld [vmem:[%s6383_s9 + $0x18c] ss:$16 sps:$4 sm:$0xff]  }
 0x2fc   :  { %2684 = vmatpush2.bf16.msra.mxu0 %v4590_v31  ;;  %2727 = vmatpush2.bf16.msra.mxu1 %v4683_v44  ;;  %v4662_v31 = vld [vmem:[%s6383_s9 + $0x188] ss:$16 sps:$4 sm:$0xff]  }
 0x2fd   :  { %2739 = vmatprep.subr.bf16.mxu0 %v4598_v34  ;;  %2782 = vmatprep.subr.bf16.mxu1 %v4691_v46  ;;  %v1847_v34 = vcombine.high %v5861_v39, %v5861_v39  ;;  %v4682_v46 = vld [vmem:[%s6383_s9 + $0x12c] ss:$16 sps:$4 sm:$0xff]  }
 0x2ff   :  { %v1864_v44 = vpack.i.b16 %v1847_v34, %v1847_v34  ;;  %v4755_v34 = vld [vmem:[%s6386_s11 + $0x10] ss:$8 sps:$4 sm:$0xff]  }
 0x33f   :  { %v1681_v49 = vpop.f32.mrf.mxu0  ;;  %v1724_v50 = vpop.f32.mrf.mxu1 }
 0x340   :  { %v1725_v59 = vadd.f32 %v1724_v50, %v1681_v49  ;;  %v4680_v50 = vld [vmem:[%s6383_s9 + $0x128] ss:$16 sps:$4 sm:$0xff]  }
 0x341   :  { %v1683_v51 = vpop.f32.mrf.mxu0  ;;  %v1726_v52 = vpop.f32.mrf.mxu1 }
 0x342   :  { %v1727_v63 = vadd.f32 %v1726_v52, %v1683_v51  ;;  %v1869_v51 = vrot.slane %v1864_v44, %v5127_v58  ;;  %v4761_v44 = vld [vmem:[%s6386_s11 + $0xf0] ss:$8 sps:$4 sm:$0xff]  }
 0x343   :  { %v1685_v56 = vpop.f32.mrf.mxu0  ;;  %v1728_v57 = vpop.f32.mrf.mxu1 }
 0x344   :  { %v1729_v60 = vadd.f32 %v1728_v57, %v1685_v56 }
 0x345   :  { %v1687_v55 = vpop.f32.mrf.mxu0  ;;  %v1730_v62 = vpop.f32.mrf.mxu1 }
 0x346   :  { %v1819_v0 = vpack.c.bf16 %v1729_v60, %v1725_v59  ;;  %v1731_v1 = vadd.f32 %v1730_v62, %v1687_v55  ;;  %v1876_v60 = vrot.slane %v1871_v47, %v5127_v58  ;;  %v4686_v55 = vld [vmem:[%s6383_s9 + $0x108] ss:$16 sps:$4 sm:$0xff]  }
 0x347   :  { %v4722_v47 = vld [vmem:[%s6383_s9 + $0x388] ss:$16 sps:$4 sm:$0xff]  }
 0x348   :  { %v1820_v3 = vpack.c.bf16 %v1731_v1, %v1727_v63  ;;  %v1877_v4 = vadd.bf16 %v1855_v61, %v1819_v0  ;;  %v4689_v1 = vld [vmem:[%s6383_s9 + $0x2e8] ss:$16 sps:$4 sm:$0xff]  }
 0x34a   :  { %v1878_v5 = vadd.bf16 %v1862_v2, %v1820_v3  ;;  %v5877_v8 = vmax.bf16 %v4865_v26, %v1877_v4  ;;  %v4694_v3 = vld [vmem:[%s6383_s9 + $0x2cc] ss:$16 sps:$4 sm:$0xff]   ;;  %v4692_v4 = vld [vmem:[%s6383_s9 + $0x2c8] ss:$16 sps:$4 sm:$0xff]  }
 0x34c   :  { %v1882_v6 = vmax.bf16 %v4865_v26, %v1878_v5  ;;  %v4697_v5 = vld [vmem:[%s6383_s9 + $0x2ac] ss:$16 sps:$4 sm:$0xff]  }
 0x34e   :  { %2685 = vmatprep.mubr.bf16.mxu0 %v1882_v6 }
 0x34f   :  { %2686 = vmatmul.mubr.bf16.vlgmr.msra.gmra.mxu0 %v5877_v8 }
 0x350   :  { %2740 = vmatpush1.bf16.msra.mxu0 %v4596_v7  ;;  %2771 = vmatprep.mubr.bf16.mxu0 %v1882_v6  ;;  %v4695_v6 = vld [vmem:[%s6383_s9 + $0x2a8] ss:$16 sps:$4 sm:$0xff]   ;;  %v4700_v7 = vld [vmem:[%s6383_s9 + $0x28c] ss:$16 sps:$4 sm:$0xff]  }
 0x351   :  { %2741 = vmatprep.subr.bf16.mxu0 %v4604_v9  ;;  %v4739_v9 = vld [vmem:[%s6386_s11 + $0x74] ss:$8 sps:$4 sm:$0xff]  }
 0x354   :  { %2742 = vmatpush1.bf16.msra.mxu0 %v4602_v10  ;;  %v4698_v10 = vld [vmem:[%s6383_s9 + $0x288] ss:$16 sps:$4 sm:$0xff]  }
 0x355   :  { %2743 = vmatprep.subr.bf16.mxu0 %v4610_v11  ;;  %v4742_v11 = vld [vmem:[%s6386_s11 + $0x64] ss:$8 sps:$4 sm:$0xff]  }
 0x358   :  { %2744 = vmatpush1.bf16.msra.mxu0 %v4608_v12  ;;  %v4703_v12 = vld [vmem:[%s6383_s9 + $0x26c] ss:$16 sps:$4 sm:$0xff]  }
 0x359   :  { %2745 = vmatprep.subr.bf16.mxu0 %v4616_v13  ;;  %v4740_v13 = vld [vmem:[%s6386_s11 + $0x60] ss:$8 sps:$4 sm:$0xff]  }
 0x35c   :  { %2746 = vmatpush1.bf16.msra.mxu0 %v4614_v14  ;;  %v4745_v14 = vld [vmem:[%s6386_s11 + $0x54] ss:$8 sps:$4 sm:$0xff]  }
 0x35d   :  { %2747 = vmatprep.subr.bf16.mxu0 %v4622_v15  ;;  %v4701_v15 = vld [vmem:[%s6383_s9 + $0x268] ss:$16 sps:$4 sm:$0xff]  }
 0x360   :  { %2748 = vmatpush1.bf16.msra.mxu0 %v4620_v16  ;;  %v4706_v16 = vld [vmem:[%s6383_s9 + $0x24c] ss:$16 sps:$4 sm:$0xff]  }
 0x361   :  { %2749 = vmatprep.subr.bf16.mxu0 %v4628_v17  ;;  %v4743_v17 = vld [vmem:[%s6386_s11 + $0x50] ss:$8 sps:$4 sm:$0xff]  }
 0x364   :  { %2750 = vmatpush1.bf16.msra.mxu0 %v4626_v18  ;;  %v4748_v18 = vld [vmem:[%s6386_s11 + $0x44] ss:$8 sps:$4 sm:$0xff]  }
 0x365   :  { %2751 = vmatprep.subr.bf16.mxu0 %v4634_v19  ;;  %v4704_v19 = vld [vmem:[%s6383_s9 + $0x248] ss:$16 sps:$4 sm:$0xff]  }
 0x368   :  { %2752 = vmatpush1.bf16.msra.mxu0 %v4632_v20  ;;  %v4709_v20 = vld [vmem:[%s6383_s9 + $0x22c] ss:$16 sps:$4 sm:$0xff]  }
 0x369   :  { %2753 = vmatprep.subr.bf16.mxu0 %v4640_v21  ;;  %v4746_v21 = vld [vmem:[%s6386_s11 + $0x40] ss:$8 sps:$4 sm:$0xff]  }
 0x36c   :  { %2754 = vmatpush1.bf16.msra.mxu0 %v4638_v22  ;;  %v4751_v22 = vld [vmem:[%s6386_s11 + $0x34] ss:$8 sps:$4 sm:$0xff]  }
 0x36d   :  { %2755 = vmatprep.subr.bf16.mxu0 %v4646_v23  ;;  %v4707_v23 = vld [vmem:[%s6383_s9 + $0x228] ss:$16 sps:$4 sm:$0xff]  }
 0x370   :  { %2756 = vmatpush2.bf16.msra.mxu0 %v4644_v24  ;;  %v4712_v24 = vld [vmem:[%s6383_s9 + $0x20c] ss:$16 sps:$4 sm:$0xff]  }
 0x371   :  { %2757 = vmatprep.subr.bf16.mxu0 %v4652_v25  ;;  %v4749_v25 = vld [vmem:[%s6386_s11 + $0x30] ss:$8 sps:$4 sm:$0xff]  }
 0x374   :  { %2758 = vmatpush2.bf16.msra.mxu0 %v4650_v27  ;;  %v4754_v27 = vld [vmem:[%s6386_s11 + $0x24] ss:$8 sps:$4 sm:$0xff]  }
 0x375   :  { %2759 = vmatprep.subr.bf16.mxu0 %v4658_v28  ;;  %v4710_v28 = vld [vmem:[%s6383_s9 + $0x208] ss:$16 sps:$4 sm:$0xff]  }
 0x378   :  { %2760 = vmatpush2.bf16.msra.mxu0 %v4656_v29  ;;  %v4715_v29 = vld [vmem:[%s6383_s9 + $0x3ec] ss:$16 sps:$4 sm:$0xff]  }
 0x379   :  { %2761 = vmatprep.subr.bf16.mxu0 %v4664_v30  ;;  %v4752_v30 = vld [vmem:[%s6386_s11 + $0x20] ss:$8 sps:$4 sm:$0xff]  }
 0x37c   :  { %2762 = vmatpush2.bf16.msra.mxu0 %v4662_v31  ;;  %v4757_v31 = vld [vmem:[%s6386_s11 + $0x14] ss:$8 sps:$4 sm:$0xff]  }
 0x37d   :  { %2763 = vmatprep.subr.bf16.mxu0 %v4670_v32  ;;  %v4713_v32 = vld [vmem:[%s6383_s9 + $0x3e8] ss:$16 sps:$4 sm:$0xff]  }
 0x37f   :  { %v1767_v37 = vpop.f32.mrf.mxu0  ;;  %v1810_v40 = vpop.f32.mrf.mxu1 }
 0x380   :  { %2764 = vmatpush2.bf16.msra.mxu0 %v4668_v33  ;;  %v1811_v49 = vadd.f32 %v1810_v40, %v1767_v37  ;;  %v4718_v33 = vld [vmem:[%s6383_s9 + $0x3cc] ss:$16 sps:$4 sm:$0xff]   ;;  %v4758_v40 = vld [vmem:[%s6386_s11] ss:$8 sps:$4 sm:$0xff]  }
 0x381   :  { %v1769_v42 = vpop.f32.mrf.mxu0  ;;  %v1812_v43 = vpop.f32.mrf.mxu1  ;;  %2765 = vmatprep.subr.bf16.mxu0 %v4676_v35  ;;  %v4760_v35 = vld [vmem:[%s6386_s11 + $0x4] ss:$8 sps:$4 sm:$0xff]  }
 0x382   :  { %v1813_v56 = vadd.f32 %v1812_v43, %v1769_v42  ;;  %v4721_v37 = vld [vmem:[%s6383_s9 + $0x3ac] ss:$16 sps:$4 sm:$0xff]   ;;  %v4719_v42 = vld [vmem:[%s6383_s9 + $0x3a8] ss:$16 sps:$4 sm:$0xff]  }
 0x383   :  { %v1771_v38 = vpop.f32.mrf.mxu0  ;;  %v1814_v39 = vpop.f32.mrf.mxu1  ;;  %v4724_v43 = vld [vmem:[%s6383_s9 + $0x38c] ss:$16 sps:$4 sm:$0xff]  }
 0x384   :  { %v1815_v48 = vadd.f32 %v1814_v39, %v1771_v38  ;;  %2766 = vmatpush2.bf16.msra.mxu0 %v4674_v41  ;;  %v4763_v41 = vld [vmem:[%s6386_s11 + $0xf4] ss:$8 sps:$4 sm:$0xff]   ;;  %v4764_v39 = vld [vmem:[%s6386_s11 + $0xe0] ss:$8 sps:$4 sm:$0xff]  }
 0x385   :  { %v1773_v52 = vpop.f32.mrf.mxu0  ;;  %v1816_v53 = vpop.f32.mrf.mxu1  ;;  %2767 = vmatprep.subr.bf16.mxu0 %v4682_v46  ;;  %v4766_v46 = vld [vmem:[%s6386_s11 + $0xe4] ss:$8 sps:$4 sm:$0xff]  }
 0x386   :  { %v1821_v57 = vpack.c.bf16 %v1815_v48, %v1811_v49  ;;  %v1817_v59 = vadd.f32 %v1816_v53, %v1773_v52  ;;  %v4727_v38 = vld [vmem:[%s6383_s9 + $0x36c] ss:$16 sps:$4 sm:$0xff]   ;;  %v4725_v48 = vld [vmem:[%s6383_s9 + $0x368] ss:$16 sps:$4 sm:$0xff]  }
 0x387   :  { %v4769_v49 = vld [vmem:[%s6386_s11 + $0xd4] ss:$8 sps:$4 sm:$0xff]   ;;  %v4772_v52 = vld [vmem:[%s6386_s11 + $0xc4] ss:$8 sps:$4 sm:$0xff]   ;;  %v4728_v53 = vld [vmem:[%s6383_s9 + $0x348] ss:$16 sps:$4 sm:$0xff]  }
 0x388   :  { %v1822_v61 = vpack.c.bf16 %v1817_v59, %v1813_v56  ;;  %2768 = vmatpush2.bf16.msra.mxu0 %v4680_v50  ;;  %v1879_v62 = vadd.bf16 %v1869_v51, %v1821_v57  ;;  %v4730_v50 = vld [vmem:[%s6383_s9 + $0x34c] ss:$16 sps:$4 sm:$0xff]   ;;  %v4767_v51 = vld [vmem:[%s6386_s11 + $0xd0] ss:$8 sps:$4 sm:$0xff]   ;;  %v4770_v56 = vld [vmem:[%s6386_s11 + $0xc0] ss:$8 sps:$4 sm:$0xff]  }
 0x389   :  { %2769 = vmatprep.subr.bf16.mxu0 %v4688_v54  ;;  %v4733_v54 = vld [vmem:[%s6383_s9 + $0x32c] ss:$16 sps:$4 sm:$0xff]   ;;  %v4731_v57 = vld [vmem:[%s6383_s9 + $0x328] ss:$16 sps:$4 sm:$0xff]  }
 0x38a   :  { %v1880_v63 = vadd.bf16 %v1876_v60, %v1822_v61  ;;  %v5981_v2 = vmax.bf16 %v4865_v26, %v1879_v62  ;;  %v4736_v59 = vld [vmem:[%s6383_s9 + $0x30c] ss:$16 sps:$4 sm:$0xff]   ;;  %v4734_v60 = vld [vmem:[%s6383_s9 + $0x308] ss:$16 sps:$4 sm:$0xff]  }
 0x38b   :  { %v4775_v61 = vld [vmem:[%s6386_s11 + $0xb4] ss:$8 sps:$4 sm:$0xff]   ;;  %v4778_v62 = vld [vmem:[%s6386_s11 + $0xa4] ss:$8 sps:$4 sm:$0xff]  }
 0x38c   :  { %2770 = vmatpush2.bf16.msra.mxu0 %v4686_v55  ;;  %v1884_v0 = vmax.bf16 %v4865_v26, %v1880_v63  ;;  %v4773_v55 = vld [vmem:[%s6386_s11 + $0xb0] ss:$8 sps:$4 sm:$0xff]   ;;  %v4776_v63 = vld [vmem:[%s6386_s11 + $0xa0] ss:$8 sps:$4 sm:$0xff]  }
 0x38d   :  { %3275 = vmatprep.subr.bf16.mxu0 %v4739_v9  ;;  %v4791_v9 = vld [vmem:[%s6386_s11 + $0x150] ss:$8 sps:$4 sm:$0xff]  }
 0x38e   :  { %2728 = vmatprep.mubr.bf16.mxu1 %v1884_v0 }
 0x38f   :  { %2729 = vmatmul.mubr.bf16.vlgmr.msra.gmra.mxu1 %v5981_v2  ;;  %2772 = vmatmul.mubr.bf16.vlgmr.msra.gmra.mxu0 %v5877_v8  ;;  %v4737_v8 = vld [vmem:[%s6386_s11 + $0x70] ss:$8 sps:$4 sm:$0xff]  }
 0x390   :  { %2783 = vmatpush1.bf16.msra.mxu1 %v4689_v1  ;;  %2814 = vmatprep.mubr.bf16.mxu1 %v1884_v0  ;;  %v4781_v0 = vld [vmem:[%s6386_s11 + $0x94] ss:$8 sps:$4 sm:$0xff]   ;;  %v4779_v1 = vld [vmem:[%s6386_s11 + $0x90] ss:$8 sps:$4 sm:$0xff]  }
 0x391   :  { %2784 = vmatprep.subr.bf16.mxu1 %v4694_v3  ;;  %3276 = vmatpush1.bf16.msra.mxu0 %v4737_v8  ;;  %v4784_v3 = vld [vmem:[%s6386_s11 + $0x84] ss:$8 sps:$4 sm:$0xff]   ;;  %v4793_v8 = vld [vmem:[%s6386_s11 + $0x154] ss:$8 sps:$4 sm:$0xff]  }
 0x392   :  { %3277 = vmatprep.subr.bf16.mxu0 %v4742_v11  ;;  %v4794_v11 = vld [vmem:[%s6386_s11 + $0x140] ss:$8 sps:$4 sm:$0xff]  }
 0x394   :  { %2785 = vmatpush1.bf16.msra.mxu1 %v4692_v4  ;;  %v4787_v4 = vld [vmem:[%s6386_s11 + $0x174] ss:$8 sps:$4 sm:$0xff]  }
 0x395   :  { %2786 = vmatprep.subr.bf16.mxu1 %v4697_v5  ;;  %3278 = vmatpush1.bf16.msra.mxu0 %v4740_v13  ;;  %v4785_v5 = vld [vmem:[%s6386_s11 + $0x170] ss:$8 sps:$4 sm:$0xff]  }
 0x396   :  { %3279 = vmatprep.subr.bf16.mxu0 %v4745_v14  ;;  %v4797_v13 = vld [vmem:[%s6386_s11 + $0x130] ss:$8 sps:$4 sm:$0xff]   ;;  %v4802_v14 = vld [vmem:[%s6386_s11 + $0x124] ss:$8 sps:$4 sm:$0xff]  }
 0x398   :  { %2787 = vmatpush1.bf16.msra.mxu1 %v4695_v6  ;;  %v4790_v6 = vld [vmem:[%s6386_s11 + $0x164] ss:$8 sps:$4 sm:$0xff]  }
 0x399   :  { %2788 = vmatprep.subr.bf16.mxu1 %v4700_v7  ;;  %3280 = vmatpush1.bf16.msra.mxu0 %v4743_v17  ;;  %v4788_v7 = vld [vmem:[%s6386_s11 + $0x160] ss:$8 sps:$4 sm:$0xff]   ;;  %v4803_v17 = vld [vmem:[%s6386_s11 + $0x110] ss:$8 sps:$4 sm:$0xff]  }
 0x39a   :  { %3281 = vmatprep.subr.bf16.mxu0 %v4748_v18  ;;  %v4808_v18 = vld [vmem:[%s6386_s11 + $0x104] ss:$8 sps:$4 sm:$0xff]  }
 0x39c   :  { %2789 = vmatpush1.bf16.msra.mxu1 %v4698_v10  ;;  %v4796_v10 = vld [vmem:[%s6386_s11 + $0x144] ss:$8 sps:$4 sm:$0xff]  }
 0x39d   :  { %2790 = vmatprep.subr.bf16.mxu1 %v4703_v12  ;;  %3282 = vmatpush1.bf16.msra.mxu0 %v4746_v21  ;;  %v4799_v12 = vld [vmem:[%s6386_s11 + $0x134] ss:$8 sps:$4 sm:$0xff]   ;;  %v4809_v21 = vld [vmem:[%s6386_s11 + $0x1f0] ss:$8 sps:$4 sm:$0xff]  }
 0x39e   :  { %3283 = vmatprep.subr.bf16.mxu0 %v4751_v22  ;;  %v4814_v22 = vld [vmem:[%s6386_s11 + $0x1e4] ss:$8 sps:$4 sm:$0xff]  }
 0x3a0   :  { %2791 = vmatpush1.bf16.msra.mxu1 %v4701_v15  ;;  %v4800_v15 = vld [vmem:[%s6386_s11 + $0x120] ss:$8 sps:$4 sm:$0xff]  }
 0x3a1   :  { %2792 = vmatprep.subr.bf16.mxu1 %v4706_v16  ;;  %3284 = vmatpush1.bf16.msra.mxu0 %v4749_v25  ;;  %v4805_v16 = vld [vmem:[%s6386_s11 + $0x114] ss:$8 sps:$4 sm:$0xff]   ;;  %v4815_v25 = vld [vmem:[%s6386_s11 + $0x1d0] ss:$8 sps:$4 sm:$0xff]  }
 0x3a2   :  { %3285 = vmatprep.subr.bf16.mxu0 %v4754_v27  ;;  %v4820_v27 = vld [vmem:[%s6386_s11 + $0x1c4] ss:$8 sps:$4 sm:$0xff]  }
 0x3a4   :  { %2793 = vmatpush1.bf16.msra.mxu1 %v4704_v19  ;;  %v4806_v19 = vld [vmem:[%s6386_s11 + $0x100] ss:$8 sps:$4 sm:$0xff]  }
 0x3a5   :  { %2794 = vmatprep.subr.bf16.mxu1 %v4709_v20  ;;  %3286 = vmatpush1.bf16.msra.mxu0 %v4752_v30  ;;  %v4811_v20 = vld [vmem:[%s6386_s11 + $0x1f4] ss:$8 sps:$4 sm:$0xff]   ;;  %v4821_v30 = vld [vmem:[%s6386_s11 + $0x1b0] ss:$8 sps:$4 sm:$0xff]  }
 0x3a6   :  { %3287 = vmatprep.subr.bf16.mxu0 %v4757_v31  ;;  %v4826_v31 = vld [vmem:[%s6386_s11 + $0x1a4] ss:$8 sps:$4 sm:$0xff]  }
 0x3a8   :  { %2795 = vmatpush1.bf16.msra.mxu1 %v4707_v23  ;;  %v4812_v23 = vld [vmem:[%s6386_s11 + $0x1e0] ss:$8 sps:$4 sm:$0xff]  }
 0x3a9   :  { %2796 = vmatprep.subr.bf16.mxu1 %v4712_v24  ;;  %3288 = vmatpush1.bf16.msra.mxu0 %v4755_v34  ;;  %v4817_v24 = vld [vmem:[%s6386_s11 + $0x1d4] ss:$8 sps:$4 sm:$0xff]   ;;  %v4827_v34 = vld [vmem:[%s6386_s11 + $0x190] ss:$8 sps:$4 sm:$0xff]  }
 0x3aa   :  { %3289 = vmatprep.subr.bf16.mxu0 %v4760_v35  ;;  %v4832_v35 = vld [vmem:[%s6386_s11 + $0x184] ss:$8 sps:$4 sm:$0xff]  }
 0x3ac   :  { %2797 = vmatpush1.bf16.msra.mxu1 %v4710_v28  ;;  %v4818_v28 = vld [vmem:[%s6386_s11 + $0x1c0] ss:$8 sps:$4 sm:$0xff]  }
 0x3ad   :  { %2798 = vmatprep.subr.bf16.mxu1 %v4715_v29  ;;  %3290 = vmatpush1.bf16.msra.mxu0 %v4758_v40  ;;  %v4823_v29 = vld [vmem:[%s6386_s11 + $0x1b4] ss:$8 sps:$4 sm:$0xff]  }
 0x3ae   :  { %3291 = vmatprep.subr.bf16.mxu0 %v4763_v41 }
 0x3b0   :  { %2799 = vmatpush2.bf16.msra.mxu1 %v4713_v32  ;;  %v4824_v32 = vld [vmem:[%s6386_s11 + $0x1a0] ss:$8 sps:$4 sm:$0xff]  }
 0x3b1   :  { %2800 = vmatprep.subr.bf16.mxu1 %v4718_v33  ;;  %3292 = vmatpush2.bf16.msra.mxu0 %v4761_v44  ;;  %v4829_v33 = vld [vmem:[%s6386_s11 + $0x194] ss:$8 sps:$4 sm:$0xff]  }
 0x3b2   :  { %3293 = vmatprep.subr.bf16.mxu0 %v4766_v46 }
 0x3b4   :  { %2801 = vmatpush2.bf16.msra.mxu1 %v4716_v36  ;;  %v4830_v36 = vld [vmem:[%s6386_s11 + $0x180] ss:$8 sps:$4 sm:$0xff]  }
 0x3b5   :  { %2802 = vmatprep.subr.bf16.mxu1 %v4721_v37  ;;  %3294 = vmatpush2.bf16.msra.mxu0 %v4764_v39  ;;  %v4056_v37 = vld.sshfl [vmem:[%s6387_s10] sm:$0x33 pattern:$0x75316420] }
 0x3b6   :  { %3295 = vmatprep.subr.bf16.mxu0 %v4769_v49  ;;  %v2838_v41 = vcombine.high %v4056_v37, %v4056_v37 }
 0x3b8   :  { %2803 = vmatpush2.bf16.msra.mxu1 %v4719_v42  ;;  %v2852_v44 = vrot.slane %v2838_v41, %v5252_v45  ;;  %v4846_v41 = vld [vmem:[%s6388_s13 + $0x8] sm:$0xff]  }
 0x3b9   :  { %2804 = vmatprep.subr.bf16.mxu1 %v4724_v43  ;;  %3296 = vmatpush2.bf16.msra.mxu0 %v4767_v51  ;;  %v2845_v43 = vrot.slane %v4056_v37, %v5252_v45  ;;  %v4844_v37 = vld [vmem:[%s6388_s13 + $0x10] sm:$0xff]  }
 0x3ba   :  { %3297 = vmatprep.subr.bf16.mxu0 %v4772_v52  ;;  %v2863_v49 = vpack.i.b16 %v2852_v44, %v2852_v44 }
 0x3bb   :  { %v2856_v39 = vpack.i.b16 %v2845_v43, %v2845_v43 }
 0x3bc   :  { %2805 = vmatpush2.bf16.msra.mxu1 %v4722_v47 }
 0x3bd   :  { %2806 = vmatprep.subr.bf16.mxu1 %v4727_v38  ;;  %3298 = vmatpush2.bf16.msra.mxu0 %v4770_v56 }
 0x3be   :  { %3299 = vmatprep.subr.bf16.mxu0 %v4775_v61 }
 0x3c0   :  { %2807 = vmatpush2.bf16.msra.mxu1 %v4725_v48 }
 0x3c1   :  { %2808 = vmatprep.subr.bf16.mxu1 %v4730_v50  ;;  %3300 = vmatpush2.bf16.msra.mxu0 %v4773_v55 }
 0x3c2   :  { %3301 = vmatprep.subr.bf16.mxu0 %v4778_v62 }
 0x3c4   :  { %2809 = vmatpush2.bf16.msra.mxu1 %v4728_v53  ;;  %v2861_v53 = vrot.slane %v2856_v39, %v5127_v58  ;;  %v4852_v39 = vld [vmem:[%s6389_s15 + $0x20] sm:$0xff]  }
 0x3c5   :  { %2810 = vmatprep.subr.bf16.mxu1 %v4733_v54  ;;  %3302 = vmatpush2.bf16.msra.mxu0 %v4776_v63 }
 0x3c6   :  { %3303 = vmatprep.subr.bf16.mxu0 %v4781_v0 }
 0x3c8   :  { %2811 = vmatpush2.bf16.msra.mxu1 %v4731_v57 }
 0x3c9   :  { %2812 = vmatprep.subr.bf16.mxu1 %v4736_v59  ;;  %3304 = vmatpush2.bf16.msra.mxu0 %v4779_v1 }
 0x3ca   :  { %3305 = vmatprep.subr.bf16.mxu0 %v4784_v3  ;;  %v2853_v3 = vcombine.high %v2845_v43, %v2845_v43  ;;  %v4848_v43 = vld [vmem:[%s6388_s13] sm:$0xff]  }
 0x3cc   :  { %2813 = vmatpush2.bf16.msra.mxu1 %v4734_v60  ;;  %v2868_v60 = vrot.slane %v2863_v49, %v5127_v58  ;;  %v4121_v49 = vld.sshfl [vmem:[%s6390_s12] sm:$0x11 pattern:$0x75316420] }
 0x3cd   :  { %3318 = vmatprep.subr.bf16.mxu1 %v4787_v4  ;;  %v2854_v4 = vcombine.high %v2852_v44, %v2852_v44  ;;  %v4867_v44 = vmov 0.0  }
 0x3cf   :  { %2815 = vmatmul.mubr.bf16.vlgmr.msra.gmra.mxu1 %v5981_v2  ;;  %v4782_v2 = vld [vmem:[%s6386_s11 + $0x80] ss:$8 sps:$4 sm:$0xff]  }
 0x3d0   :  { %3306 = vmatpush2.bf16.msra.mxu0 %v4782_v2  ;;  %3319 = vmatpush1.bf16.msra.mxu1 %v4785_v5 }
 0x3d1   :  { %3320 = vmatprep.subr.bf16.mxu1 %v4790_v6 }
 0x3d4   :  { %3321 = vmatpush1.bf16.msra.mxu1 %v4788_v7 }
 0x3d5   :  { %3322 = vmatprep.subr.bf16.mxu1 %v4793_v8  ;;  %v2870_v8 = vpack.i.b16 %v2853_v3, %v2853_v3 }
 0x3d8   :  { %3323 = vmatpush1.bf16.msra.mxu1 %v4791_v9  ;;  %v2877_v9 = vpack.i.b16 %v2854_v4, %v2854_v4 }
 0x3d9   :  { %3324 = vmatprep.subr.bf16.mxu1 %v4796_v10 }
 0x3dc   :  { %3325 = vmatpush1.bf16.msra.mxu1 %v4794_v11 }
 0x3dd   :  { %3326 = vmatprep.subr.bf16.mxu1 %v4799_v12 }
 0x3e0   :  { %3327 = vmatpush1.bf16.msra.mxu1 %v4797_v13 }
 0x3e1   :  { %3328 = vmatprep.subr.bf16.mxu1 %v4802_v14  ;;  %v2875_v14 = vrot.slane %v2870_v8, %v5127_v58 }
 0x3e4   :  { %3329 = vmatpush1.bf16.msra.mxu1 %v4800_v15 }
 0x3e5   :  { %3330 = vmatprep.subr.bf16.mxu1 %v4805_v16 }
 0x3e8   :  { %3331 = vmatpush1.bf16.msra.mxu1 %v4803_v17 }
 0x3e9   :  { %3332 = vmatprep.subr.bf16.mxu1 %v4808_v18 }
 0x3ec   :  { %3333 = vmatpush1.bf16.msra.mxu1 %v4806_v19  ;;  %v2882_v19 = vrot.slane %v2877_v9, %v5127_v58 }
 0x3ed   :  { %3334 = vmatprep.subr.bf16.mxu1 %v4811_v20 }
 0x3f0   :  { %3335 = vmatpush2.bf16.msra.mxu1 %v4809_v21 }
 0x3f1   :  { %3336 = vmatprep.subr.bf16.mxu1 %v4814_v22 }
 0x3f4   :  { %3337 = vmatpush2.bf16.msra.mxu1 %v4812_v23 }
 0x3f5   :  { %3338 = vmatprep.subr.bf16.mxu1 %v4817_v24 }
 0x3f8   :  { %3339 = vmatpush2.bf16.msra.mxu1 %v4815_v25  ;;  %v4833_v25 = vld [vmem:[%s6388_s13 + $0x78] sm:$0xff]  }
 0x3f9   :  { %3340 = vmatprep.subr.bf16.mxu1 %v4820_v27  ;;  %v4834_v27 = vld [vmem:[%s6388_s13 + $0x38] sm:$0xff]   ;;  %4159 = vmatprep.subr.bf16.mxu0 %v4833_v25 }
 0x3fc   :  { %3341 = vmatpush2.bf16.msra.mxu1 %v4818_v28  ;;  %v4835_v28 = vld [vmem:[%s6388_s13 + $0x70] sm:$0xff]  }
 0x3fd   :  { %3342 = vmatprep.subr.bf16.mxu1 %v4823_v29  ;;  %v4836_v29 = vld [vmem:[%s6388_s13 + $0x30] sm:$0xff]  }
 0x400   :  { %3343 = vmatpush2.bf16.msra.mxu1 %v4821_v30  ;;  %v4837_v30 = vld [vmem:[%s6388_s13 + $0x68] sm:$0xff]  }
 0x401   :  { %3344 = vmatprep.subr.bf16.mxu1 %v4826_v31  ;;  %v4838_v31 = vld [vmem:[%s6388_s13 + $0x28] sm:$0xff]  }
 0x404   :  { %3345 = vmatpush2.bf16.msra.mxu1 %v4824_v32  ;;  %v4839_v32 = vld [vmem:[%s6388_s13 + $0x60] sm:$0xff]  }
 0x405   :  { %3346 = vmatprep.subr.bf16.mxu1 %v4829_v33  ;;  %v4840_v33 = vld [vmem:[%s6388_s13 + $0x20] sm:$0xff]  }
 0x408   :  { %3347 = vmatpush2.bf16.msra.mxu1 %v4827_v34  ;;  %v4841_v34 = vld [vmem:[%s6388_s13 + $0x58] sm:$0xff]  }
 0x409   :  { %3348 = vmatprep.subr.bf16.mxu1 %v4832_v35  ;;  %v4842_v35 = vld [vmem:[%s6388_s13 + $0x18] sm:$0xff]  }
 0x40c   :  { %3349 = vmatpush2.bf16.msra.mxu1 %v4830_v36  ;;  %v4843_v36 = vld [vmem:[%s6388_s13 + $0x50] sm:$0xff]  }
 0x40d   :  { %4209 = vmatprep.subr.bf16.mxu1 %v4867_v44 }
 0x40f   :  { %v2687_v40 = vpop.f32.mrf.mxu0 }
 0x411   :  { %v2689_v42 = vpop.f32.mrf.mxu0 }
 0x413   :  { %v2691_v47 = vpop.f32.mrf.mxu0 }
 0x415   :  { %v2693_v52 = vpop.f32.mrf.mxu0 }
 0x44f   :  { %v2730_v46 = vpop.f32.mrf.mxu1  ;;  %v2773_v1 = vpop.f32.mrf.mxu0 }
 0x450   :  { %v2731_v50 = vadd.f32 %v2730_v46, %v2687_v40  ;;  %v4845_v40 = vld [vmem:[%s6388_s13 + $0x48] sm:$0xff]   ;;  %v4849_v46 = vld [vmem:[%s6389_s15 + $0x38] sm:$0xff]  }
 0x451   :  { %v2732_v38 = vpop.f32.mrf.mxu1  ;;  %v2775_v2 = vpop.f32.mrf.mxu0 }
 0x452   :  { %v2733_v56 = vadd.f32 %v2732_v38, %v2689_v42  ;;  %v4847_v42 = vld [vmem:[%s6388_s13 + $0x40] sm:$0xff]   ;;  %v4851_v38 = vld [vmem:[%s6389_s15 + $0x28] sm:$0xff]  }
 0x453   :  { %v2734_v48 = vpop.f32.mrf.mxu1  ;;  %v2777_v6 = vpop.f32.mrf.mxu0 }
 0x454   :  { %v2735_v51 = vadd.f32 %v2734_v48, %v2691_v47  ;;  %v4850_v47 = vld [vmem:[%s6389_s15 + $0x30] sm:$0xff]  }
 0x455   :  { %v2736_v54 = vpop.f32.mrf.mxu1  ;;  %v2779_v13 = vpop.f32.mrf.mxu0 }
 0x456   :  { %v2825_v57 = vpack.c.bf16 %v2735_v51, %v2731_v50  ;;  %v2737_v59 = vadd.f32 %v2736_v54, %v2693_v52  ;;  %v3372_v50 = vcombine.high %v4121_v49, %v4121_v49  ;;  %v3379_v52 = vrot.slane %v4121_v49, %v5252_v45 }
 0x458   :  { %v2826_v61 = vpack.c.bf16 %v2737_v59, %v2733_v56  ;;  %v2883_v55 = vadd.bf16 %v2861_v53, %v2825_v57  ;;  %v3386_v53 = vrot.slane %v3372_v50, %v5252_v45  ;;  %v3388_v59 = vpack.i.b16 %v3379_v52, %v3379_v52 }
 0x45a   :  { %v2884_v62 = vadd.bf16 %v2868_v60, %v2826_v61  ;;  %v2887_v0 = vmax.bf16 %v4865_v26, %v2883_v55  ;;  %v3395_v60 = vpack.i.b16 %v3386_v53, %v3386_v53 }
 0x45c   :  { %v2888_v63 = vmax.bf16 %v4865_v26, %v2884_v62 }
 0x45e   :  { %3307 = vmatprep.mubr.bf16.mxu0 %v2888_v63 }
 0x45f   :  { %3308 = vmatmul.mubr.bf16.vlgmr.msra.gmra.mxu0 %v2887_v0  ;;  %v3393_v0 = vrot.slane %v3388_v59, %v5127_v58 }
 0x460   :  { %4160 = vmatpush3.bf16.msra.mxu0 %v4834_v27  ;;  %v4138_v27 = vld [vmem:[%s6392_s16] ss:$0 sm:$0xff] }
 0x461   :  { %4161 = vmatprep.subr.bf16.mxu0 %v4835_v28 }
 0x464   :  { %4162 = vmatpush3.bf16.msra.mxu0 %v4836_v29 }
 0x465   :  { %4163 = vmatprep.subr.bf16.mxu0 %v4837_v30 }
 0x468   :  { %4164 = vmatpush3.bf16.msra.mxu0 %v4838_v31 }
 0x469   :  { %4165 = vmatprep.subr.bf16.mxu0 %v4839_v32 }
 0x46c   :  { %4166 = vmatpush3.bf16.msra.mxu0 %v4840_v33 }
 0x46d   :  { %4167 = vmatprep.subr.bf16.mxu0 %v4841_v34 }
 0x470   :  { %4168 = vmatpush3.bf16.msra.mxu0 %v4842_v35 }
 0x471   :  { %4169 = vmatprep.subr.bf16.mxu0 %v4843_v36 }
 0x474   :  { %4170 = vmatpush3.bf16.msra.mxu0 %v4844_v37 }
 0x475   :  { %4171 = vmatprep.subr.bf16.mxu0 %v4845_v40 }
 0x478   :  { %4172 = vmatpush3.bf16.msra.mxu0 %v4846_v41 }
 0x479   :  { %4173 = vmatprep.subr.bf16.mxu0 %v4847_v42 }
 0x47c   :  { %4174 = vmatpush3.bf16.msra.mxu0 %v4848_v43 }
 0x48f   :  { %v2816_v5 = vpop.f32.mrf.mxu1 }
 0x490   :  { %v2817_v11 = vadd.f32 %v2816_v5, %v2773_v1  ;;  %v3400_v5 = vrot.slane %v3395_v60, %v5127_v58 }
 0x491   :  { %v2818_v7 = vpop.f32.mrf.mxu1 }
 0x492   :  { %v2819_v16 = vadd.f32 %v2818_v7, %v2775_v2 }
 0x493   :  { %v2820_v10 = vpop.f32.mrf.mxu1 }
 0x494   :  { %v2821_v12 = vadd.f32 %v2820_v10, %v2777_v6  ;;  %v4853_v10 = vld [vmem:[%s6389_s15 + $0x18] sm:$0xff]  }
 0x495   :  { %v2822_v15 = vpop.f32.mrf.mxu1 }
 0x496   :  { %v2827_v17 = vpack.c.bf16 %v2821_v12, %v2817_v11  ;;  %v2823_v18 = vadd.f32 %v2822_v15, %v2779_v13  ;;  %v4854_v11 = vld [vmem:[%s6389_s15 + $0x10] sm:$0xff]   ;;  %v4855_v12 = vld [vmem:[%s6389_s15 + $0x8] sm:$0xff]   ;;  %v4856_v13 = vld [vmem:[%s6389_s15] sm:$0xff]  }
 0x497   :  { %v3575_v15 = vld [vmem:[%s6391_s14] sm:$0x1] }
 0x498   :  { %v2828_v20 = vpack.c.bf16 %v2823_v18, %v2819_v16  ;;  %v2885_v21 = vadd.bf16 %v2875_v14, %v2827_v17  ;;  %v3577_v17 = vpack.i.b16 %v3575_v15, %v3575_v15 }
 0x49a   :  { %v2886_v22 = vadd.bf16 %v2882_v19, %v2828_v20  ;;  %v2889_v24 = vmax.bf16 %v4865_v26, %v2885_v21 }
 0x49c   :  { %v2890_v23 = vmax.bf16 %v4865_v26, %v2886_v22  ;;  %v3582_v22 = vrot.slane %v3577_v17, %v5127_v58 }
 0x49e   :  { %3350 = vmatprep.mubr.bf16.mxu1 %v2890_v23 }
 0x49f   :  { %3351 = vmatmul.mubr.bf16.vlgmr.msra.gmra.mxu1 %v2889_v24 }
 0x4a0   :  { %4210 = vmatpush3.bf16.msra.mxu1 %v4849_v46  ;;  %4225 = vmatprep.mubr.msk.bf16.mxu1 %vm4868_vm1, %v4867_v44 }
 0x4a1   :  { %4211 = vmatprep.subr.bf16.mxu1 %v4867_v44 }
 0x4a4   :  { %4212 = vmatpush3.bf16.msra.mxu1 %v4850_v47 }
 0x4a5   :  { %4213 = vmatprep.subr.bf16.mxu1 %v4867_v44 }
 0x4a8   :  { %4214 = vmatpush3.bf16.msra.mxu1 %v4851_v38 }
 0x4a9   :  { %4215 = vmatprep.subr.bf16.mxu1 %v4867_v44 }
 0x4ac   :  { %4216 = vmatpush3.bf16.msra.mxu1 %v4852_v39 }
 0x4ad   :  { %4217 = vmatprep.subr.bf16.mxu1 %v4867_v44 }
 0x4b0   :  { %4218 = vmatpush3.bf16.msra.mxu1 %v4853_v10 }
 0x4b1   :  { %4219 = vmatprep.subr.bf16.mxu1 %v4867_v44 }
 0x4b4   :  { %4220 = vmatpush3.bf16.msra.mxu1 %v4854_v11 }
 0x4b5   :  { %4221 = vmatprep.subr.bf16.mxu1 %v4867_v44 }
 0x4b8   :  { %4222 = vmatpush3.bf16.msra.mxu1 %v4855_v12 }
 0x4b9   :  { %4223 = vmatprep.subr.bf16.mxu1 %v4867_v44 }
 0x4bc   :  { %4224 = vmatpush3.bf16.msra.mxu1 %v4856_v13 }
 0x51f   :  { %v3309_v48 = vpop.f32.mrf.mxu0 }
 0x521   :  { %v3311_v51 = vpop.f32.mrf.mxu0 }
 0x523   :  { %v3313_v56 = vpop.f32.mrf.mxu0 }
 0x525   :  { %v3315_v63 = vpop.f32.mrf.mxu0 }
 0x55f   :  { %v3352_v54 = vpop.f32.mrf.mxu1 }
 0x560   :  { %v3353_v55 = vadd.f32 %v3352_v54, %v3309_v48 }
 0x561   :  { %v3354_v57 = vpop.f32.mrf.mxu1 }
 0x562   :  { %v3355_v2 = vadd.f32 %v3354_v57, %v3311_v51 }
 0x563   :  { %v3356_v61 = vpop.f32.mrf.mxu1 }
 0x564   :  { %v3357_v62 = vadd.f32 %v3356_v61, %v3313_v56 }
 0x565   :  { %v3358_v1 = vpop.f32.mrf.mxu1 }
 0x566   :  { %v3361_v3 = vpack.c.bf16 %v3357_v62, %v3353_v55  ;;  %v3359_v4 = vadd.f32 %v3358_v1, %v3315_v63 }
 0x568   :  { %v3362_v6 = vpack.c.bf16 %v3359_v4, %v3355_v2  ;;  %v3401_v7 = vadd.bf16 %v3393_v0, %v3361_v3 }
 0x56a   :  { %v3402_v45 = vadd.bf16 %v3400_v5, %v3362_v6  ;;  %v3403_v9 = vmax.bf16 %v4865_v26, %v3401_v7 }
 0x56c   :  { %v3404_v8 = vmax.bf16 %v4865_v26, %v3402_v45 }
 0x56e   :  { %3565 = vmatprep.mubr.bf16.mxu0 %v3404_v8 }
 0x56f   :  { %3566 = vmatmul.mubr.bf16.vlgmr.msra.gmra.mxu0 %v3403_v9 }
 0x62f   :  { %v4175_v14 = vpop.f32.mrf.mxu0 }
 0x631   :  { %v4176_v16 = vpop.f32.mrf.mxu0 }
 0x632   :  { %v4177_v20 = vadd.f32 %v4176_v16, %v4175_v14 }
 0x633   :  { %v4178_v18 = vpop.f32.mrf.mxu0 }
 0x635   :  { %v4179_v19 = vpop.f32.mrf.mxu0 }
 0x636   :  { %v4180_v21 = vadd.f32 %v4179_v19, %v4178_v18 }
 0x638   :  { %v3574_v23 = vpack.c.bf16 %v4180_v21, %v4177_v20 }
 0x63a   :  { %v3583_v24 = vadd.bf16 %v3582_v22, %v3574_v23 }
 0x63c   :  { %v3584_v25 = vmax.bf16 %v4865_v26, %v3583_v24 }
 0x63e   :  { %4226 = vmatmul.mubr.bf16.vlgmr.msra.gmra.mxu1 %v3584_v25 }
 0x6fe   :  { %v3690_v28 = vpop.f32.mrf.mxu1 }
 0x6ff   :  { %v3691_v29 = vadd.f32 %v4138_v27, %v3690_v28 }
 0x700   :  { %v4227_v30 = vpop.f32.mrf.mxu1 }
 0x701   :  { %v4147_v31 = vmul.f32 -1.442695, %v3691_v29 }
 0x702   :  { %v3693_v32 = vpop.f32.mrf.mxu1 }
 0x703   :  { %4857 = vpow2.f32 %v4147_v31  ;;  %v3694_v33 = vadd.f32 %v4138_v27, %v3693_v32 }
 0x704   :  { %v4228_v34 = vpop.f32.mrf.mxu1 }
 0x705   :  { %v4148_v35 = vmul.f32 -1.442695, %v3694_v33 }
 0x707   :  { %4859 = vpow2.f32 %v4148_v35 }
 0x710   :  { %v4858_v58 = vpop.eup %4857 }
 0x711   :  { %v3703_v36 = vadd.f32 1.0, %v4858_v58 }
 0x713   :  { %4861 = vrcp.f32 %v3703_v36 }
 0x714   :  { %v4860_v37 = vpop.eup %4859 }
 0x715   :  { %v3704_v26 = vadd.f32 1.0, %v4860_v37 }
 0x717   :  { %4863 = vrcp.f32 %v3704_v26 }
 0x720   :  { %v4862_v40 = vpop.eup %4861 }
 0x721   :  { %3709 = vst [vmem:[%s6393_s17] sm:$0xff] %v4862_v40 }
 0x724   :  { %v4864_v41 = vpop.eup %4863 }
 0x725   :  { %3710 = vst [vmem:[%s6393_s17 + $0x8] sm:$0xff] %v4864_v41 }

</bundles_post_ra>
